<compile_context>
chip_gen: v7x
topology: tpu7x:2x2x1
jax: 0.10.0
libtpu: 0.0.40
codegen_flags: <defaults>
</compile_context>

<pallas_src>
import math
import functools

import jax
import jax.numpy as jnp
from jax.experimental import pallas as pl
from jax.experimental.pallas import tpu as pltpu

# ----------------------------- config (small, synthetic) -----------------------------
B = 2          # batch
T = 8          # prediction_length
S = 8          # encoder (key/value) sequence length
D = 32         # embed_dim
HEADS = 4      # decoder_attn_heads
DH = D // HEADS
FF_EXP = 2     # decoder_ff_expansion
DFF = D * FF_EXP

# MXU operands are bf16 (accumulation in f32). Both the kernel and the in-script
# reference use the same casting so the 5e-2 check validates the Pallas lowering
# against an XLA execution of identical math.
MXU_DTYPE = jnp.bfloat16


def positional_encoding_table(length: int, dim: int) -> jnp.ndarray:
    """Standard sinusoidal table, shape (length, dim)."""
    pos = jnp.arange(length, dtype=jnp.float32)[:, None]
    i = jnp.arange(dim)[None, :]
    rates = 1.0 / jnp.power(10000.0, (2 * (i // 2)).astype(jnp.float32) / dim)
    ang = pos * rates
    return jnp.where(i % 2 == 0, jnp.sin(ang), jnp.cos(ang)).astype(jnp.float32)


# ------------------------------- shared math (kernel body) ---------------------------
def _cast_mxu(t):
    return t.astype(MXU_DTYPE)


def _softmax_last(x, in_kernel):
    m = jnp.max(x, axis=-1, keepdims=True)
    e = jnp.exp(x - m)
    s = jnp.sum(e, axis=-1, keepdims=True)
    if in_kernel:
        return e * pl.reciprocal(s, approx=True)   # EUP slot; VALU stays free
    return e / s                                   # exact division in the reference


def _dot(a, b):
    """bf16-operand matmul, f32 accumulation."""
    return jnp.dot(_cast_mxu(a), _cast_mxu(b), preferred_element_type=jnp.float32)


def _split_heads(x, off):
    """x: (B, L, F) packed features. Take D contiguous cols starting at `off` and
    split into heads -> (HEADS*B, L, DH), leading index = h*B + b (head-major).
    Leading-dim concat only; no 4-D transposes."""
    return jnp.concatenate(
        [x[..., off + h * DH: off + (h + 1) * DH] for h in range(HEADS)], axis=0)


def _merge_heads(ctx, Bn):
    """(HEADS*B, L, DH) -> (B, L, D): head h goes back to feature cols [h*DH:(h+1)*DH]."""
    return jnp.concatenate([ctx[h * Bn:(h + 1) * Bn] for h in range(HEADS)], axis=-1)


def _avg_heads(p, Bn):
    """(HEADS*B, Lq, Lk) -> head-averaged (B, Lq, Lk)."""
    acc = p[:Bn]
    for h in range(1, HEADS):
        acc = acc + p[h * Bn:(h + 1) * Bn]
    return acc * (1.0 / HEADS)


def _mha(q_h, k_h, v_h, Bn, in_kernel, need_attn=True):
    """Head-batched attention core.
    q_h: (HEADS*B, Lq, DH); k_h / v_h: (HEADS*B, Lk, DH) (v_h may be None).
    Returns (merged context (B, Lq, D) or None, head-averaged attention (B, Lq, Lk) or None)."""
    scale = 1.0 / math.sqrt(DH)
    sc = jnp.einsum("bqd,bkd->bqk", _cast_mxu(q_h), _cast_mxu(k_h),
                    preferred_element_type=jnp.float32) * scale     # ONE batched dot
    p = _softmax_last(sc, in_kernel)                 # ONE softmax; attn_dropout: identity
    attn = _avg_heads(p, Bn) if need_attn else None
    if v_h is None:
        return None, attn
    ctx = jnp.einsum("bqk,bkd->bqd", _cast_mxu(p), _cast_mxu(v_h),
                     preferred_element_type=jnp.float32)             # ONE batched dot
    return _merge_heads(ctx, Bn), attn


def _decoder_block_math(x, kv, pe,
                        w_s_qkv, b_s_qkv, w_s_qk, b_s_qk, w_s_o, b_s_o,
                        w_c_q, b_c_q, w_c_kv, b_c_kv, w_c_o, b_c_o,
                        w1, b1, w2, b2, in_kernel):
    """Full DecoderBlock forward, batched. x: (B, T, D), kv: (B, S, D)."""
    Bn, Tn, Dn = x.shape
    Sn = kv.shape[1]

    xp = x + pe[None, :, :]                               # positional encoding
    xp2 = xp.reshape(Bn * Tn, Dn)
    x2 = x.reshape(Bn * Tn, Dn)

    # --- temporal self-attention: ONE packed (Q|K|V) projection matmul ---
    qkv_t = (_dot(xp2, w_s_qkv) + b_s_qkv).reshape(Bn, Tn, 3 * Dn)
    ctx_t, temporal_attn = _mha(_split_heads(qkv_t, 0),
                                _split_heads(qkv_t, Dn),
                                _split_heads(qkv_t, 2 * Dn),
                                Bn, in_kernel)
    dec_out = (_dot(ctx_t.reshape(Bn * Tn, Dn), w_s_o) + b_s_o).reshape(Bn, Tn, Dn)

    # --- spatial self-attention (shared weights, attention map only): packed (Q|K) ---
    # V projection / context / output projection are dead paths and never emitted.
    qk_s = (_dot(x2, w_s_qk) + b_s_qk).reshape(Bn, Tn, 2 * Dn)
    _, spatial_attn = _mha(_split_heads(qk_s, 0), _split_heads(qk_s, Dn), None,
                           Bn, in_kernel)

    st_attn = jnp.einsum("bij,bjk->bik", _cast_mxu(spatial_attn), _cast_mxu(temporal_attn),
                         preferred_element_type=jnp.float32)       # (B, T, T)
    dec = jnp.einsum("bij,bjd->bid", _cast_mxu(st_attn), _cast_mxu(dec_out),
                     preferred_element_type=jnp.float32)           # (B, T, D)

    # --- cross-attention: Q from dec; ONE packed (K|V) projection of encoder states ---
    q_c = (_dot(dec.reshape(Bn * Tn, Dn), w_c_q) + b_c_q).reshape(Bn, Tn, Dn)
    kv_c = (_dot(kv.reshape(Bn * Sn, Dn), w_c_kv) + b_c_kv).reshape(Bn, Sn, 2 * Dn)
    ctx_c, _ = _mha(_split_heads(q_c, 0), _split_heads(kv_c, 0), _split_heads(kv_c, Dn),
                    Bn, in_kernel, need_attn=False)
    cross_out = (_dot(ctx_c.reshape(Bn * Tn, Dn), w_c_o) + b_c_o)

    # --- FeedForwardBlock: Linear -> GELU -> Linear   (ff_dropout: identity, eval) ---
    # TODO(synk): PyTorch nn.GELU defaults to exact erf; tanh approximation used here.
    h1 = jax.nn.gelu(_dot(cross_out, w1) + b1, approximate=True)
    y = _dot(h1, w2) + b2
    return y.reshape(Bn, Tn, Dn)


# ----------------------------------- Pallas kernel -----------------------------------
def decoder_block_kernel(hid_ref, kv_ref, pos_ref,
                         w_s_qkv_ref, b_s_qkv_ref, w_s_qk_ref, b_s_qk_ref,
                         w_s_o_ref, b_s_o_ref,
                         w_c_q_ref, b_c_q_ref, w_c_kv_ref, b_c_kv_ref,
                         w_c_o_ref, b_c_o_ref,
                         w1_ref, b1_ref, w2_ref, b2_ref,
                         out_ref):
    out_ref[...] = _decoder_block_math(
        hid_ref[...], kv_ref[...], pos_ref[...],
        w_s_qkv_ref[...], b_s_qkv_ref[...], w_s_qk_ref[...], b_s_qk_ref[...],
        w_s_o_ref[...], b_s_o_ref[...],
        w_c_q_ref[...], b_c_q_ref[...], w_c_kv_ref[...], b_c_kv_ref[...],
        w_c_o_ref[...], b_c_o_ref[...],
        w1_ref[...], b1_ref[...], w2_ref[...], b2_ref[...],
        in_kernel=True)


def _pack_attn_params(sw, sb, cw, cb):
    """Pack (4, D, D)/(4, D) attention params into lane-dense 2-D slabs (wrapper side)."""
    w_s_qkv = jnp.concatenate([sw[0], sw[1], sw[2]], axis=1)            # (D, 3D)
    b_s_qkv = jnp.concatenate([sb[0], sb[1], sb[2]], axis=0)[None, :]   # (1, 3D)
    w_s_qk = jnp.concatenate([sw[0], sw[1]], axis=1)                    # (D, 2D)
    b_s_qk = jnp.concatenate([sb[0], sb[1]], axis=0)[None, :]           # (1, 2D)
    w_c_kv = jnp.concatenate([cw[1], cw[2]], axis=1)                    # (D, 2D)
    b_c_kv = jnp.concatenate([cb[1], cb[2]], axis=0)[None, :]           # (1, 2D)
    return (w_s_qkv, b_s_qkv, w_s_qk, b_s_qk, sw[3], sb[3][None, :],
            cw[0], cb[0][None, :], w_c_kv, b_c_kv, cw[3], cb[3][None, :])


@functools.partial(jax.jit, static_argnames=("split_batch_grid",))
def decoder_block(hidden, kv_states, pos, sw, sb, cw, cb, w1, b1, w2, b2,
                  split_batch_grid=False):
    Bn, Tn, Dn = hidden.shape
    Sn = kv_states.shape[1]
    Dff = w1.shape[1]

    packed = _pack_attn_params(sw, sb, cw, cb)   # cheap one-time XLA concats

    # Single invocation over the whole batch by default (working set is a few tens of
    # KiB — far under scoped VMEM on every generation). The v7x 2-TensorCore batch
    # split is size-gated by the caller; at these shapes it never pays.
    bb = 1 if split_batch_grid else Bn
    grid = (Bn // bb,)

    def whole(shape):
        return pl.BlockSpec(shape, lambda b, _s=shape: (0,) * len(_s))

    in_specs = [
        pl.BlockSpec((bb, Tn, Dn), lambda b: (b, 0, 0)),    # hidden_states
        pl.BlockSpec((bb, Sn, Dn), lambda b: (b, 0, 0)),    # key_value_states
        whole((Tn, Dn)),                                    # positional encoding table
        whole((Dn, 3 * Dn)), whole((1, 3 * Dn)),            # self-attn packed Q|K|V
        whole((Dn, 2 * Dn)), whole((1, 2 * Dn)),            # self-attn packed Q|K (spatial)
        whole((Dn, Dn)), whole((1, Dn)),                    # self-attn out proj
        whole((Dn, Dn)), whole((1, Dn)),                    # cross-attn Q proj
        whole((Dn, 2 * Dn)), whole((1, 2 * Dn)),            # cross-attn packed K|V
        whole((Dn, Dn)), whole((1, Dn)),                    # cross-attn out proj
        whole((Dn, Dff)), whole((1, Dff)),                  # mlp W1 / b1
        whole((Dff, Dn)), whole((1, Dn)),                   # mlp W2 / b2
    ]
    out_specs = pl.BlockSpec((bb, Tn, Dn), lambda b: (b, 0, 0))

    return pl.pallas_call(
        decoder_block_kernel,
        grid=grid,
        in_specs=in_specs,
        out_specs=out_specs,
        out_shape=jax.ShapeDtypeStruct((Bn, Tn, Dn), jnp.float32),
        compiler_params=pltpu.CompilerParams(dimension_semantics=("parallel",)),
    )(hidden, kv_states, pos, *packed, w1, b1, w2, b2)


def decoder_block_reference(hidden, kv_states, pos, sw, sb, cw, cb, w1, b1, w2, b2):
    """Pure-JAX reference: identical math (incl. bf16 MXU operands), exact softmax division."""
    packed = _pack_attn_params(sw, sb, cw, cb)
    return _decoder_block_math(hidden, kv_states, pos, *packed, w1, b1, w2, b2,
                               in_kernel=False)


# -------------------------------------- main -----------------------------------------
if __name__ == "__main__":
    key = jax.random.PRNGKey(0)
    ks = jax.random.split(key, 10)

    hidden = jax.random.normal(ks[0], (B, T, D), jnp.float32)
    kv_states = jax.random.normal(ks[1], (B, S, D), jnp.float32)
    pos = positional_encoding_table(T, D)

    wscale = 1.0 / math.sqrt(D)
    sw = jax.random.normal(ks[2], (4, D, D), jnp.float32) * wscale   # self-attn q,k,v,o
    sb = jax.random.normal(ks[3], (4, D), jnp.float32) * 0.01
    cw = jax.random.normal(ks[4], (4, D, D), jnp.float32) * wscale   # cross-attn q,k,v,o
    cb = jax.random.normal(ks[5], (4, D), jnp.float32) * 0.01
    w1 = jax.random.normal(ks[6], (D, DFF), jnp.float32) * wscale
    b1 = jax.random.normal(ks[7], (1, DFF), jnp.float32) * 0.01
    w2 = jax.random.normal(ks[8], (DFF, D), jnp.float32) * (1.0 / math.sqrt(DFF))
    b2 = jax.random.normal(ks[9], (1, D), jnp.float32) * 0.01

    # v7x batch split across the two TensorCores only pays once the per-core work
    # amortizes the ~0.35-1 us per-invocation overhead + duplicated weight DMAs;
    # at B=2, T=S=8, D=32 it never does, so it is size-gated (off here).
    kind = jax.devices()[0].device_kind.lower()
    split = ("v7" in kind) and (B % 2 == 0) and (B * T * D >= (1 << 16))

    out = decoder_block(hidden, kv_states, pos, sw, sb, cw, cb, w1, b1, w2, b2,
                        split_batch_grid=split)
    out = jax.block_until_ready(out)

    ref = decoder_block_reference(hidden, kv_states, pos, sw, sb, cw, cb,
                                  w1, b1, w2, b2)
    ref = jax.block_until_ready(ref)

    assert out.shape == (B, T, D)
    assert bool(jnp.all(jnp.isfinite(out)))
    max_err = float(jnp.max(jnp.abs(out - ref)))
    assert max_err < 5e-2, f"kernel/reference mismatch: {max_err}"
    print("KERNEL_OK")
</pallas_src>

<mosaic_0001>
module attributes {stable_mosaic.version = 11 : i64} {
  func.func @decoder_block_kernel(%arg0: i32, %arg1: memref<2x8x32xf32, #tpu.memory_space<vmem>>, %arg2: memref<2x8x32xf32, #tpu.memory_space<vmem>>, %arg3: memref<8x32xf32, #tpu.memory_space<vmem>>, %arg4: memref<32x96xf32, #tpu.memory_space<vmem>>, %arg5: memref<1x96xf32, #tpu.memory_space<vmem>>, %arg6: memref<32x64xf32, #tpu.memory_space<vmem>>, %arg7: memref<1x64xf32, #tpu.memory_space<vmem>>, %arg8: memref<32x32xf32, #tpu.memory_space<vmem>>, %arg9: memref<1x32xf32, #tpu.memory_space<vmem>>, %arg10: memref<32x32xf32, #tpu.memory_space<vmem>>, %arg11: memref<1x32xf32, #tpu.memory_space<vmem>>, %arg12: memref<32x64xf32, #tpu.memory_space<vmem>>, %arg13: memref<1x64xf32, #tpu.memory_space<vmem>>, %arg14: memref<32x32xf32, #tpu.memory_space<vmem>>, %arg15: memref<1x32xf32, #tpu.memory_space<vmem>>, %arg16: memref<32x64xf32, #tpu.memory_space<vmem>>, %arg17: memref<1x64xf32, #tpu.memory_space<vmem>>, %arg18: memref<64x32xf32, #tpu.memory_space<vmem>>, %arg19: memref<1x32xf32, #tpu.memory_space<vmem>>, %arg20: memref<2x8x32xf32, #tpu.memory_space<vmem>>) attributes {dimension_semantics = [#tpu.dimension_semantics<parallel>], iteration_bounds = array<i64: 1>, scalar_prefetch = 0 : i64, scratch_operands = 0 : i64, tpu.core_type = #tpu.core_type<tc>, window_params = [{transform_indices = @transform_0, window_bounds = array<i64: 2, 8, 32>}, {transform_indices = @transform_1, window_bounds = array<i64: 2, 8, 32>}, {pipeline_mode = #tpu.pipeline_mode<synchronous>, transform_indices = @transform_2, window_bounds = array<i64: 8, 32>}, {pipeline_mode = #tpu.pipeline_mode<synchronous>, transform_indices = @transform_3, window_bounds = array<i64: 32, 96>}, {pipeline_mode = #tpu.pipeline_mode<synchronous>, transform_indices = @transform_4, window_bounds = array<i64: 1, 96>}, {pipeline_mode = #tpu.pipeline_mode<synchronous>, transform_indices = @transform_5, window_bounds = array<i64: 32, 64>}, {pipeline_mode = #tpu.pipeline_mode<synchronous>, transform_indices = @transform_6, window_bounds = array<i64: 1, 64>}, {pipeline_mode = #tpu.pipeline_mode<synchronous>, transform_indices = @transform_7, window_bounds = array<i64: 32, 32>}, {pipeline_mode = #tpu.pipeline_mode<synchronous>, transform_indices = @transform_8, window_bounds = array<i64: 1, 32>}, {pipeline_mode = #tpu.pipeline_mode<synchronous>, transform_indices = @transform_9, window_bounds = array<i64: 32, 32>}, {pipeline_mode = #tpu.pipeline_mode<synchronous>, transform_indices = @transform_10, window_bounds = array<i64: 1, 32>}, {pipeline_mode = #tpu.pipeline_mode<synchronous>, transform_indices = @transform_11, window_bounds = array<i64: 32, 64>}, {pipeline_mode = #tpu.pipeline_mode<synchronous>, transform_indices = @transform_12, window_bounds = array<i64: 1, 64>}, {pipeline_mode = #tpu.pipeline_mode<synchronous>, transform_indices = @transform_13, window_bounds = array<i64: 32, 32>}, {pipeline_mode = #tpu.pipeline_mode<synchronous>, transform_indices = @transform_14, window_bounds = array<i64: 1, 32>}, {pipeline_mode = #tpu.pipeline_mode<synchronous>, transform_indices = @transform_15, window_bounds = array<i64: 32, 64>}, {pipeline_mode = #tpu.pipeline_mode<synchronous>, transform_indices = @transform_16, window_bounds = array<i64: 1, 64>}, {pipeline_mode = #tpu.pipeline_mode<synchronous>, transform_indices = @transform_17, window_bounds = array<i64: 64, 32>}, {pipeline_mode = #tpu.pipeline_mode<synchronous>, transform_indices = @transform_18, window_bounds = array<i64: 1, 32>}, {transform_indices = @transform_19, window_bounds = array<i64: 2, 8, 32>}]} {
    %c0 = arith.constant 0 : index
    %c0_0 = arith.constant 0 : index
    %c0_1 = arith.constant 0 : index
    %0 = vector.load %arg1[%c0, %c0_0, %c0_1] : memref<2x8x32xf32, #tpu.memory_space<vmem>>, vector<2x8x32xf32>
    %c0_2 = arith.constant 0 : index
    %c0_3 = arith.constant 0 : index
    %c0_4 = arith.constant 0 : index
    %1 = vector.load %arg2[%c0_2, %c0_3, %c0_4] : memref<2x8x32xf32, #tpu.memory_space<vmem>>, vector<2x8x32xf32>
    %c0_5 = arith.constant 0 : index
    %c0_6 = arith.constant 0 : index
    %2 = vector.load %arg3[%c0_5, %c0_6] : memref<8x32xf32, #tpu.memory_space<vmem>>, vector<8x32xf32>
    %c0_7 = arith.constant 0 : index
    %c0_8 = arith.constant 0 : index
    %3 = vector.load %arg4[%c0_7, %c0_8] : memref<32x96xf32, #tpu.memory_space<vmem>>, vector<32x96xf32>
    %c0_9 = arith.constant 0 : index
    %c0_10 = arith.constant 0 : index
    %4 = vector.load %arg5[%c0_9, %c0_10] : memref<1x96xf32, #tpu.memory_space<vmem>>, vector<1x96xf32>
    %c0_11 = arith.constant 0 : index
    %c0_12 = arith.constant 0 : index
    %5 = vector.load %arg6[%c0_11, %c0_12] : memref<32x64xf32, #tpu.memory_space<vmem>>, vector<32x64xf32>
    %c0_13 = arith.constant 0 : index
    %c0_14 = arith.constant 0 : index
    %6 = vector.load %arg7[%c0_13, %c0_14] : memref<1x64xf32, #tpu.memory_space<vmem>>, vector<1x64xf32>
    %c0_15 = arith.constant 0 : index
    %c0_16 = arith.constant 0 : index
    %7 = vector.load %arg8[%c0_15, %c0_16] : memref<32x32xf32, #tpu.memory_space<vmem>>, vector<32x32xf32>
    %c0_17 = arith.constant 0 : index
    %c0_18 = arith.constant 0 : index
    %8 = vector.load %arg9[%c0_17, %c0_18] : memref<1x32xf32, #tpu.memory_space<vmem>>, vector<1x32xf32>
    %c0_19 = arith.constant 0 : index
    %c0_20 = arith.constant 0 : index
    %9 = vector.load %arg10[%c0_19, %c0_20] : memref<32x32xf32, #tpu.memory_space<vmem>>, vector<32x32xf32>
    %c0_21 = arith.constant 0 : index
    %c0_22 = arith.constant 0 : index
    %10 = vector.load %arg11[%c0_21, %c0_22] : memref<1x32xf32, #tpu.memory_space<vmem>>, vector<1x32xf32>
    %c0_23 = arith.constant 0 : index
    %c0_24 = arith.constant 0 : index
    %11 = vector.load %arg12[%c0_23, %c0_24] : memref<32x64xf32, #tpu.memory_space<vmem>>, vector<32x64xf32>
    %c0_25 = arith.constant 0 : index
    %c0_26 = arith.constant 0 : index
    %12 = vector.load %arg13[%c0_25, %c0_26] : memref<1x64xf32, #tpu.memory_space<vmem>>, vector<1x64xf32>
    %c0_27 = arith.constant 0 : index
    %c0_28 = arith.constant 0 : index
    %13 = vector.load %arg14[%c0_27, %c0_28] : memref<32x32xf32, #tpu.memory_space<vmem>>, vector<32x32xf32>
    %c0_29 = arith.constant 0 : index
    %c0_30 = arith.constant 0 : index
    %14 = vector.load %arg15[%c0_29, %c0_30] : memref<1x32xf32, #tpu.memory_space<vmem>>, vector<1x32xf32>
    %c0_31 = arith.constant 0 : index
    %c0_32 = arith.constant 0 : index
    %15 = vector.load %arg16[%c0_31, %c0_32] : memref<32x64xf32, #tpu.memory_space<vmem>>, vector<32x64xf32>
    %c0_33 = arith.constant 0 : index
    %c0_34 = arith.constant 0 : index
    %16 = vector.load %arg17[%c0_33, %c0_34] : memref<1x64xf32, #tpu.memory_space<vmem>>, vector<1x64xf32>
    %c0_35 = arith.constant 0 : index
    %c0_36 = arith.constant 0 : index
    %17 = vector.load %arg18[%c0_35, %c0_36] : memref<64x32xf32, #tpu.memory_space<vmem>>, vector<64x32xf32>
    %c0_37 = arith.constant 0 : index
    %c0_38 = arith.constant 0 : index
    %18 = vector.load %arg19[%c0_37, %c0_38] : memref<1x32xf32, #tpu.memory_space<vmem>>, vector<1x32xf32>
    %19 = vector.shape_cast %2 : vector<8x32xf32> to vector<1x8x32xf32>
    %20 = vector.broadcast %19 : vector<1x8x32xf32> to vector<2x8x32xf32>
    %21 = arith.addf %0, %20 : vector<2x8x32xf32>
    %22 = vector.shape_cast %21 : vector<2x8x32xf32> to vector<16x32xf32>
    %23 = vector.shape_cast %0 : vector<2x8x32xf32> to vector<16x32xf32>
    %24 = arith.truncf %22 : vector<16x32xf32> to vector<16x32xbf16>
    %25 = arith.truncf %3 : vector<32x96xf32> to vector<32x96xbf16>
    %cst = arith.constant dense<0.000000e+00> : vector<16x96xf32>
    %26 = tpu.matmul %24, %25, %cst {dimension_numbers = #tpu.dot_dimension_numbers<[1], [0], [0], [1], [0, 0, 1, 1], [], []>} : vector<16x32xbf16>, vector<32x96xbf16>, vector<16x96xf32> -> vector<16x96xf32>
    %27 = vector.broadcast %4 : vector<1x96xf32> to vector<16x96xf32>
    %28 = arith.addf %26, %27 : vector<16x96xf32>
    %29 = vector.shape_cast %28 : vector<16x96xf32> to vector<2x8x96xf32>
    %30 = vector.extract_strided_slice %29 {offsets = [0, 0, 0], sizes = [2, 8, 8], strides = [1, 1, 1]} : vector<2x8x96xf32> to vector<2x8x8xf32>
    %31 = vector.extract_strided_slice %29 {offsets = [0, 0, 8], sizes = [2, 8, 8], strides = [1, 1, 1]} : vector<2x8x96xf32> to vector<2x8x8xf32>
    %32 = vector.extract_strided_slice %29 {offsets = [0, 0, 16], sizes = [2, 8, 8], strides = [1, 1, 1]} : vector<2x8x96xf32> to vector<2x8x8xf32>
    %33 = vector.extract_strided_slice %29 {offsets = [0, 0, 24], sizes = [2, 8, 8], strides = [1, 1, 1]} : vector<2x8x96xf32> to vector<2x8x8xf32>
    %34 = tpu.concatenate %30, %31, %32, %33 in 0 : vector<2x8x8xf32>, vector<2x8x8xf32>, vector<2x8x8xf32>, vector<2x8x8xf32> -> vector<8x8x8xf32>
    %35 = vector.extract_strided_slice %29 {offsets = [0, 0, 32], sizes = [2, 8, 8], strides = [1, 1, 1]} : vector<2x8x96xf32> to vector<2x8x8xf32>
    %36 = vector.extract_strided_slice %29 {offsets = [0, 0, 40], sizes = [2, 8, 8], strides = [1, 1, 1]} : vector<2x8x96xf32> to vector<2x8x8xf32>
    %37 = vector.extract_strided_slice %29 {offsets = [0, 0, 48], sizes = [2, 8, 8], strides = [1, 1, 1]} : vector<2x8x96xf32> to vector<2x8x8xf32>
    %38 = vector.extract_strided_slice %29 {offsets = [0, 0, 56], sizes = [2, 8, 8], strides = [1, 1, 1]} : vector<2x8x96xf32> to vector<2x8x8xf32>
    %39 = tpu.concatenate %35, %36, %37, %38 in 0 : vector<2x8x8xf32>, vector<2x8x8xf32>, vector<2x8x8xf32>, vector<2x8x8xf32> -> vector<8x8x8xf32>
    %40 = vector.extract_strided_slice %29 {offsets = [0, 0, 64], sizes = [2, 8, 8], strides = [1, 1, 1]} : vector<2x8x96xf32> to vector<2x8x8xf32>
    %41 = vector.extract_strided_slice %29 {offsets = [0, 0, 72], sizes = [2, 8, 8], strides = [1, 1, 1]} : vector<2x8x96xf32> to vector<2x8x8xf32>
    %42 = vector.extract_strided_slice %29 {offsets = [0, 0, 80], sizes = [2, 8, 8], strides = [1, 1, 1]} : vector<2x8x96xf32> to vector<2x8x8xf32>
    %43 = vector.extract_strided_slice %29 {offsets = [0, 0, 88], sizes = [2, 8, 8], strides = [1, 1, 1]} : vector<2x8x96xf32> to vector<2x8x8xf32>
    %44 = tpu.concatenate %40, %41, %42, %43 in 0 : vector<2x8x8xf32>, vector<2x8x8xf32>, vector<2x8x8xf32>, vector<2x8x8xf32> -> vector<8x8x8xf32>
    %45 = arith.truncf %34 : vector<8x8x8xf32> to vector<8x8x8xbf16>
    %46 = arith.truncf %39 : vector<8x8x8xf32> to vector<8x8x8xbf16>
    "tpu.trace_start"() <{level = 10 : i32, message = "bqd,bkd->bqk"}> : () -> ()
    %cst_39 = arith.constant dense<0.000000e+00> : vector<8x8x8xf32>
    %47 = tpu.matmul %45, %46, %cst_39 {dimension_numbers = #tpu.dot_dimension_numbers<[2], [2], [1], [1], [0, 0, 0, 1, 1, 1], [0], [0]>} : vector<8x8x8xbf16>, vector<8x8x8xbf16>, vector<8x8x8xf32> -> vector<8x8x8xf32>
    "tpu.trace_stop"() : () -> ()
    %cst_40 = arith.constant 0.353553385 : f32
    %48 = vector.broadcast %cst_40 : f32 to vector<8x8x8xf32>
    %49 = arith.mulf %47, %48 : vector<8x8x8xf32>
    %cst_41 = arith.constant dense<0xFF800000> : vector<8x8xf32>
    %50 = vector.multi_reduction <maximumf>, %49, %cst_41 [2] : vector<8x8x8xf32> to vector<8x8xf32>
    %51 = vector.shape_cast %50 : vector<8x8xf32> to vector<8x8x1xf32>
    %52 = vector.broadcast %51 : vector<8x8x1xf32> to vector<8x8x8xf32>
    %53 = arith.subf %49, %52 : vector<8x8x8xf32>
    %54 = math.exp %53 : vector<8x8x8xf32>
    %cst_42 = arith.constant dense<0.000000e+00> : vector<8x8xf32>
    %55 = vector.multi_reduction <add>, %54, %cst_42 [2] : vector<8x8x8xf32> to vector<8x8xf32>
    %56 = vector.shape_cast %55 : vector<8x8xf32> to vector<8x8x1xf32>
    %57 = tpu.reciprocal %56 {approx = true} : vector<8x8x1xf32> -> vector<8x8x1xf32>
    %58 = vector.broadcast %57 : vector<8x8x1xf32> to vector<8x8x8xf32>
    %59 = arith.mulf %54, %58 : vector<8x8x8xf32>
    %60 = vector.extract_strided_slice %59 {offsets = [0, 0, 0], sizes = [2, 8, 8], strides = [1, 1, 1]} : vector<8x8x8xf32> to vector<2x8x8xf32>
    %61 = vector.extract_strided_slice %59 {offsets = [2, 0, 0], sizes = [2, 8, 8], strides = [1, 1, 1]} : vector<8x8x8xf32> to vector<2x8x8xf32>
    %62 = arith.addf %60, %61 : vector<2x8x8xf32>
    %63 = vector.extract_strided_slice %59 {offsets = [4, 0, 0], sizes = [2, 8, 8], strides = [1, 1, 1]} : vector<8x8x8xf32> to vector<2x8x8xf32>
    %64 = arith.addf %62, %63 : vector<2x8x8xf32>
    %65 = vector.extract_strided_slice %59 {offsets = [6, 0, 0], sizes = [2, 8, 8], strides = [1, 1, 1]} : vector<8x8x8xf32> to vector<2x8x8xf32>
    %66 = arith.addf %64, %65 : vector<2x8x8xf32>
    %cst_43 = arith.constant 2.500000e-01 : f32
    %67 = vector.broadcast %cst_43 : f32 to vector<2x8x8xf32>
    %68 = arith.mulf %66, %67 : vector<2x8x8xf32>
    %69 = arith.truncf %59 : vector<8x8x8xf32> to vector<8x8x8xbf16>
    %70 = arith.truncf %44 : vector<8x8x8xf32> to vector<8x8x8xbf16>
    "tpu.trace_start"() <{level = 10 : i32, message = "bqk,bkd->bqd"}> : () -> ()
    %cst_44 = arith.constant dense<0.000000e+00> : vector<8x8x8xf32>
    %71 = tpu.matmul %69, %70, %cst_44 {dimension_numbers = #tpu.dot_dimension_numbers<[2], [1], [1], [2], [0, 0, 0, 1, 1, 2], [0], [0]>} : vector<8x8x8xbf16>, vector<8x8x8xbf16>, vector<8x8x8xf32> -> vector<8x8x8xf32>
    "tpu.trace_stop"() : () -> ()
    %72 = vector.extract_strided_slice %71 {offsets = [0, 0, 0], sizes = [2, 8, 8], strides = [1, 1, 1]} : vector<8x8x8xf32> to vector<2x8x8xf32>
    %73 = vector.extract_strided_slice %71 {offsets = [2, 0, 0], sizes = [2, 8, 8], strides = [1, 1, 1]} : vector<8x8x8xf32> to vector<2x8x8xf32>
    %74 = vector.extract_strided_slice %71 {offsets = [4, 0, 0], sizes = [2, 8, 8], strides = [1, 1, 1]} : vector<8x8x8xf32> to vector<2x8x8xf32>
    %75 = vector.extract_strided_slice %71 {offsets = [6, 0, 0], sizes = [2, 8, 8], strides = [1, 1, 1]} : vector<8x8x8xf32> to vector<2x8x8xf32>
    %76 = tpu.concatenate %72, %73, %74, %75 in 2 : vector<2x8x8xf32>, vector<2x8x8xf32>, vector<2x8x8xf32>, vector<2x8x8xf32> -> vector<2x8x32xf32>
    %77 = vector.shape_cast %76 : vector<2x8x32xf32> to vector<16x32xf32>
    %78 = arith.truncf %77 : vector<16x32xf32> to vector<16x32xbf16>
    %79 = arith.truncf %7 : vector<32x32xf32> to vector<32x32xbf16>
    %cst_45 = arith.constant dense<0.000000e+00> : vector<16x32xf32>
    %80 = tpu.matmul %78, %79, %cst_45 {dimension_numbers = #tpu.dot_dimension_numbers<[1], [0], [0], [1], [0, 0, 1, 1], [], []>} : vector<16x32xbf16>, vector<32x32xbf16>, vector<16x32xf32> -> vector<16x32xf32>
    %81 = vector.broadcast %8 : vector<1x32xf32> to vector<16x32xf32>
    %82 = arith.addf %80, %81 : vector<16x32xf32>
    %83 = vector.shape_cast %82 : vector<16x32xf32> to vector<2x8x32xf32>
    %84 = arith.truncf %23 : vector<16x32xf32> to vector<16x32xbf16>
    %85 = arith.truncf %5 : vector<32x64xf32> to vector<32x64xbf16>
    %cst_46 = arith.constant dense<0.000000e+00> : vector<16x64xf32>
    %86 = tpu.matmul %84, %85, %cst_46 {dimension_numbers = #tpu.dot_dimension_numbers<[1], [0], [0], [1], [0, 0, 1, 1], [], []>} : vector<16x32xbf16>, vector<32x64xbf16>, vector<16x64xf32> -> vector<16x64xf32>
    %87 = vector.broadcast %6 : vector<1x64xf32> to vector<16x64xf32>
    %88 = arith.addf %86, %87 : vector<16x64xf32>
    %89 = vector.shape_cast %88 : vector<16x64xf32> to vector<2x8x64xf32>
    %90 = vector.extract_strided_slice %89 {offsets = [0, 0, 0], sizes = [2, 8, 8], strides = [1, 1, 1]} : vector<2x8x64xf32> to vector<2x8x8xf32>
    %91 = vector.extract_strided_slice %89 {offsets = [0, 0, 8], sizes = [2, 8, 8], strides = [1, 1, 1]} : vector<2x8x64xf32> to vector<2x8x8xf32>
    %92 = vector.extract_strided_slice %89 {offsets = [0, 0, 16], sizes = [2, 8, 8], strides = [1, 1, 1]} : vector<2x8x64xf32> to vector<2x8x8xf32>
    %93 = vector.extract_strided_slice %89 {offsets = [0, 0, 24], sizes = [2, 8, 8], strides = [1, 1, 1]} : vector<2x8x64xf32> to vector<2x8x8xf32>
    %94 = tpu.concatenate %90, %91, %92, %93 in 0 : vector<2x8x8xf32>, vector<2x8x8xf32>, vector<2x8x8xf32>, vector<2x8x8xf32> -> vector<8x8x8xf32>
    %95 = vector.extract_strided_slice %89 {offsets = [0, 0, 32], sizes = [2, 8, 8], strides = [1, 1, 1]} : vector<2x8x64xf32> to vector<2x8x8xf32>
    %96 = vector.extract_strided_slice %89 {offsets = [0, 0, 40], sizes = [2, 8, 8], strides = [1, 1, 1]} : vector<2x8x64xf32> to vector<2x8x8xf32>
    %97 = vector.extract_strided_slice %89 {offsets = [0, 0, 48], sizes = [2, 8, 8], strides = [1, 1, 1]} : vector<2x8x64xf32> to vector<2x8x8xf32>
    %98 = vector.extract_strided_slice %89 {offsets = [0, 0, 56], sizes = [2, 8, 8], strides = [1, 1, 1]} : vector<2x8x64xf32> to vector<2x8x8xf32>
    %99 = tpu.concatenate %95, %96, %97, %98 in 0 : vector<2x8x8xf32>, vector<2x8x8xf32>, vector<2x8x8xf32>, vector<2x8x8xf32> -> vector<8x8x8xf32>
    %100 = arith.truncf %94 : vector<8x8x8xf32> to vector<8x8x8xbf16>
    %101 = arith.truncf %99 : vector<8x8x8xf32> to vector<8x8x8xbf16>
    "tpu.trace_start"() <{level = 10 : i32, message = "bqd,bkd->bqk"}> : () -> ()
    %cst_47 = arith.constant dense<0.000000e+00> : vector<8x8x8xf32>
    %102 = tpu.matmul %100, %101, %cst_47 {dimension_numbers = #tpu.dot_dimension_numbers<[2], [2], [1], [1], [0, 0, 0, 1, 1, 1], [0], [0]>} : vector<8x8x8xbf16>, vector<8x8x8xbf16>, vector<8x8x8xf32> -> vector<8x8x8xf32>
    "tpu.trace_stop"() : () -> ()
    %cst_48 = arith.constant 0.353553385 : f32
    %103 = vector.broadcast %cst_48 : f32 to vector<8x8x8xf32>
    %104 = arith.mulf %102, %103 : vector<8x8x8xf32>
    %cst_49 = arith.constant dense<0xFF800000> : vector<8x8xf32>
    %105 = vector.multi_reduction <maximumf>, %104, %cst_49 [2] : vector<8x8x8xf32> to vector<8x8xf32>
    %106 = vector.shape_cast %105 : vector<8x8xf32> to vector<8x8x1xf32>
    %107 = vector.broadcast %106 : vector<8x8x1xf32> to vector<8x8x8xf32>
    %108 = arith.subf %104, %107 : vector<8x8x8xf32>
    %109 = math.exp %108 : vector<8x8x8xf32>
    %cst_50 = arith.constant dense<0.000000e+00> : vector<8x8xf32>
    %110 = vector.multi_reduction <add>, %109, %cst_50 [2] : vector<8x8x8xf32> to vector<8x8xf32>
    %111 = vector.shape_cast %110 : vector<8x8xf32> to vector<8x8x1xf32>
    %112 = tpu.reciprocal %111 {approx = true} : vector<8x8x1xf32> -> vector<8x8x1xf32>
    %113 = vector.broadcast %112 : vector<8x8x1xf32> to vector<8x8x8xf32>
    %114 = arith.mulf %109, %113 : vector<8x8x8xf32>
    %115 = vector.extract_strided_slice %114 {offsets = [0, 0, 0], sizes = [2, 8, 8], strides = [1, 1, 1]} : vector<8x8x8xf32> to vector<2x8x8xf32>
    %116 = vector.extract_strided_slice %114 {offsets = [2, 0, 0], sizes = [2, 8, 8], strides = [1, 1, 1]} : vector<8x8x8xf32> to vector<2x8x8xf32>
    %117 = arith.addf %115, %116 : vector<2x8x8xf32>
    %118 = vector.extract_strided_slice %114 {offsets = [4, 0, 0], sizes = [2, 8, 8], strides = [1, 1, 1]} : vector<8x8x8xf32> to vector<2x8x8xf32>
    %119 = arith.addf %117, %118 : vector<2x8x8xf32>
    %120 = vector.extract_strided_slice %114 {offsets = [6, 0, 0], sizes = [2, 8, 8], strides = [1, 1, 1]} : vector<8x8x8xf32> to vector<2x8x8xf32>
    %121 = arith.addf %119, %120 : vector<2x8x8xf32>
    %cst_51 = arith.constant 2.500000e-01 : f32
    %122 = vector.broadcast %cst_51 : f32 to vector<2x8x8xf32>
    %123 = arith.mulf %121, %122 : vector<2x8x8xf32>
    %124 = arith.truncf %123 : vector<2x8x8xf32> to vector<2x8x8xbf16>
    %125 = arith.truncf %68 : vector<2x8x8xf32> to vector<2x8x8xbf16>
    "tpu.trace_start"() <{level = 10 : i32, message = "bij,bjk->bik"}> : () -> ()
    %cst_52 = arith.constant dense<0.000000e+00> : vector<2x8x8xf32>
    %126 = tpu.matmul %124, %125, %cst_52 {dimension_numbers = #tpu.dot_dimension_numbers<[2], [1], [1], [2], [0, 0, 0, 1, 1, 2], [0], [0]>} : vector<2x8x8xbf16>, vector<2x8x8xbf16>, vector<2x8x8xf32> -> vector<2x8x8xf32>
    "tpu.trace_stop"() : () -> ()
    %127 = arith.truncf %126 : vector<2x8x8xf32> to vector<2x8x8xbf16>
    %128 = arith.truncf %83 : vector<2x8x32xf32> to vector<2x8x32xbf16>
    "tpu.trace_start"() <{level = 10 : i32, message = "bij,bjd->bid"}> : () -> ()
    %cst_53 = arith.constant dense<0.000000e+00> : vector<2x8x32xf32>
    %129 = tpu.matmul %127, %128, %cst_53 {dimension_numbers = #tpu.dot_dimension_numbers<[2], [1], [1], [2], [0, 0, 0, 1, 1, 2], [0], [0]>} : vector<2x8x8xbf16>, vector<2x8x32xbf16>, vector<2x8x32xf32> -> vector<2x8x32xf32>
    "tpu.trace_stop"() : () -> ()
    %130 = vector.shape_cast %129 : vector<2x8x32xf32> to vector<16x32xf32>
    %131 = arith.truncf %130 : vector<16x32xf32> to vector<16x32xbf16>
    %132 = arith.truncf %9 : vector<32x32xf32> to vector<32x32xbf16>
    %cst_54 = arith.constant dense<0.000000e+00> : vector<16x32xf32>
    %133 = tpu.matmul %131, %132, %cst_54 {dimension_numbers = #tpu.dot_dimension_numbers<[1], [0], [0], [1], [0, 0, 1, 1], [], []>} : vector<16x32xbf16>, vector<32x32xbf16>, vector<16x32xf32> -> vector<16x32xf32>
    %134 = vector.broadcast %10 : vector<1x32xf32> to vector<16x32xf32>
    %135 = arith.addf %133, %134 : vector<16x32xf32>
    %136 = vector.shape_cast %135 : vector<16x32xf32> to vector<2x8x32xf32>
    %137 = vector.shape_cast %1 : vector<2x8x32xf32> to vector<16x32xf32>
    %138 = arith.truncf %137 : vector<16x32xf32> to vector<16x32xbf16>
    %139 = arith.truncf %11 : vector<32x64xf32> to vector<32x64xbf16>
    %cst_55 = arith.constant dense<0.000000e+00> : vector<16x64xf32>
    %140 = tpu.matmul %138, %139, %cst_55 {dimension_numbers = #tpu.dot_dimension_numbers<[1], [0], [0], [1], [0, 0, 1, 1], [], []>} : vector<16x32xbf16>, vector<32x64xbf16>, vector<16x64xf32> -> vector<16x64xf32>
    %141 = vector.broadcast %12 : vector<1x64xf32> to vector<16x64xf32>
    %142 = arith.addf %140, %141 : vector<16x64xf32>
    %143 = vector.shape_cast %142 : vector<16x64xf32> to vector<2x8x64xf32>
    %144 = vector.extract_strided_slice %136 {offsets = [0, 0, 0], sizes = [2, 8, 8], strides = [1, 1, 1]} : vector<2x8x32xf32> to vector<2x8x8xf32>
    %145 = vector.extract_strided_slice %136 {offsets = [0, 0, 8], sizes = [2, 8, 8], strides = [1, 1, 1]} : vector<2x8x32xf32> to vector<2x8x8xf32>
    %146 = vector.extract_strided_slice %136 {offsets = [0, 0, 16], sizes = [2, 8, 8], strides = [1, 1, 1]} : vector<2x8x32xf32> to vector<2x8x8xf32>
    %147 = vector.extract_strided_slice %136 {offsets = [0, 0, 24], sizes = [2, 8, 8], strides = [1, 1, 1]} : vector<2x8x32xf32> to vector<2x8x8xf32>
    %148 = tpu.concatenate %144, %145, %146, %147 in 0 : vector<2x8x8xf32>, vector<2x8x8xf32>, vector<2x8x8xf32>, vector<2x8x8xf32> -> vector<8x8x8xf32>
    %149 = vector.extract_strided_slice %143 {offsets = [0, 0, 0], sizes = [2, 8, 8], strides = [1, 1, 1]} : vector<2x8x64xf32> to vector<2x8x8xf32>
    %150 = vector.extract_strided_slice %143 {offsets = [0, 0, 8], sizes = [2, 8, 8], strides = [1, 1, 1]} : vector<2x8x64xf32> to vector<2x8x8xf32>
    %151 = vector.extract_strided_slice %143 {offsets = [0, 0, 16], sizes = [2, 8, 8], strides = [1, 1, 1]} : vector<2x8x64xf32> to vector<2x8x8xf32>
    %152 = vector.extract_strided_slice %143 {offsets = [0, 0, 24], sizes = [2, 8, 8], strides = [1, 1, 1]} : vector<2x8x64xf32> to vector<2x8x8xf32>
    %153 = tpu.concatenate %149, %150, %151, %152 in 0 : vector<2x8x8xf32>, vector<2x8x8xf32>, vector<2x8x8xf32>, vector<2x8x8xf32> -> vector<8x8x8xf32>
    %154 = vector.extract_strided_slice %143 {offsets = [0, 0, 32], sizes = [2, 8, 8], strides = [1, 1, 1]} : vector<2x8x64xf32> to vector<2x8x8xf32>
    %155 = vector.extract_strided_slice %143 {offsets = [0, 0, 40], sizes = [2, 8, 8], strides = [1, 1, 1]} : vector<2x8x64xf32> to vector<2x8x8xf32>
    %156 = vector.extract_strided_slice %143 {offsets = [0, 0, 48], sizes = [2, 8, 8], strides = [1, 1, 1]} : vector<2x8x64xf32> to vector<2x8x8xf32>
    %157 = vector.extract_strided_slice %143 {offsets = [0, 0, 56], sizes = [2, 8, 8], strides = [1, 1, 1]} : vector<2x8x64xf32> to vector<2x8x8xf32>
    %158 = tpu.concatenate %154, %155, %156, %157 in 0 : vector<2x8x8xf32>, vector<2x8x8xf32>, vector<2x8x8xf32>, vector<2x8x8xf32> -> vector<8x8x8xf32>
    %159 = arith.truncf %148 : vector<8x8x8xf32> to vector<8x8x8xbf16>
    %160 = arith.truncf %153 : vector<8x8x8xf32> to vector<8x8x8xbf16>
    "tpu.trace_start"() <{level = 10 : i32, message = "bqd,bkd->bqk"}> : () -> ()
    %cst_56 = arith.constant dense<0.000000e+00> : vector<8x8x8xf32>
    %161 = tpu.matmul %159, %160, %cst_56 {dimension_numbers = #tpu.dot_dimension_numbers<[2], [2], [1], [1], [0, 0, 0, 1, 1, 1], [0], [0]>} : vector<8x8x8xbf16>, vector<8x8x8xbf16>, vector<8x8x8xf32> -> vector<8x8x8xf32>
    "tpu.trace_stop"() : () -> ()
    %cst_57 = arith.constant 0.353553385 : f32
    %162 = vector.broadcast %cst_57 : f32 to vector<8x8x8xf32>
    %163 = arith.mulf %161, %162 : vector<8x8x8xf32>
    %cst_58 = arith.constant dense<0xFF800000> : vector<8x8xf32>
    %164 = vector.multi_reduction <maximumf>, %163, %cst_58 [2] : vector<8x8x8xf32> to vector<8x8xf32>
    %165 = vector.shape_cast %164 : vector<8x8xf32> to vector<8x8x1xf32>
    %166 = vector.broadcast %165 : vector<8x8x1xf32> to vector<8x8x8xf32>
    %167 = arith.subf %163, %166 : vector<8x8x8xf32>
    %168 = math.exp %167 : vector<8x8x8xf32>
    %cst_59 = arith.constant dense<0.000000e+00> : vector<8x8xf32>
    %169 = vector.multi_reduction <add>, %168, %cst_59 [2] : vector<8x8x8xf32> to vector<8x8xf32>
    %170 = vector.shape_cast %169 : vector<8x8xf32> to vector<8x8x1xf32>
    %171 = tpu.reciprocal %170 {approx = true} : vector<8x8x1xf32> -> vector<8x8x1xf32>
    %172 = vector.broadcast %171 : vector<8x8x1xf32> to vector<8x8x8xf32>
    %173 = arith.mulf %168, %172 : vector<8x8x8xf32>
    %174 = arith.truncf %173 : vector<8x8x8xf32> to vector<8x8x8xbf16>
    %175 = arith.truncf %158 : vector<8x8x8xf32> to vector<8x8x8xbf16>
    "tpu.trace_start"() <{level = 10 : i32, message = "bqk,bkd->bqd"}> : () -> ()
    %cst_60 = arith.constant dense<0.000000e+00> : vector<8x8x8xf32>
    %176 = tpu.matmul %174, %175, %cst_60 {dimension_numbers = #tpu.dot_dimension_numbers<[2], [1], [1], [2], [0, 0, 0, 1, 1, 2], [0], [0]>} : vector<8x8x8xbf16>, vector<8x8x8xbf16>, vector<8x8x8xf32> -> vector<8x8x8xf32>
    "tpu.trace_stop"() : () -> ()
    %177 = vector.extract_strided_slice %176 {offsets = [0, 0, 0], sizes = [2, 8, 8], strides = [1, 1, 1]} : vector<8x8x8xf32> to vector<2x8x8xf32>
    %178 = vector.extract_strided_slice %176 {offsets = [2, 0, 0], sizes = [2, 8, 8], strides = [1, 1, 1]} : vector<8x8x8xf32> to vector<2x8x8xf32>
    %179 = vector.extract_strided_slice %176 {offsets = [4, 0, 0], sizes = [2, 8, 8], strides = [1, 1, 1]} : vector<8x8x8xf32> to vector<2x8x8xf32>
    %180 = vector.extract_strided_slice %176 {offsets = [6, 0, 0], sizes = [2, 8, 8], strides = [1, 1, 1]} : vector<8x8x8xf32> to vector<2x8x8xf32>
    %181 = tpu.concatenate %177, %178, %179, %180 in 2 : vector<2x8x8xf32>, vector<2x8x8xf32>, vector<2x8x8xf32>, vector<2x8x8xf32> -> vector<2x8x32xf32>
    %182 = vector.shape_cast %181 : vector<2x8x32xf32> to vector<16x32xf32>
    %183 = arith.truncf %182 : vector<16x32xf32> to vector<16x32xbf16>
    %184 = arith.truncf %13 : vector<32x32xf32> to vector<32x32xbf16>
    %cst_61 = arith.constant dense<0.000000e+00> : vector<16x32xf32>
    %185 = tpu.matmul %183, %184, %cst_61 {dimension_numbers = #tpu.dot_dimension_numbers<[1], [0], [0], [1], [0, 0, 1, 1], [], []>} : vector<16x32xbf16>, vector<32x32xbf16>, vector<16x32xf32> -> vector<16x32xf32>
    %186 = vector.broadcast %14 : vector<1x32xf32> to vector<16x32xf32>
    %187 = arith.addf %185, %186 : vector<16x32xf32>
    %188 = arith.truncf %187 : vector<16x32xf32> to vector<16x32xbf16>
    %189 = arith.truncf %15 : vector<32x64xf32> to vector<32x64xbf16>
    %cst_62 = arith.constant dense<0.000000e+00> : vector<16x64xf32>
    %190 = tpu.matmul %188, %189, %cst_62 {dimension_numbers = #tpu.dot_dimension_numbers<[1], [0], [0], [1], [0, 0, 1, 1], [], []>} : vector<16x32xbf16>, vector<32x64xbf16>, vector<16x64xf32> -> vector<16x64xf32>
    %191 = vector.broadcast %16 : vector<1x64xf32> to vector<16x64xf32>
    %192 = arith.addf %190, %191 : vector<16x64xf32>
    %193 = arith.mulf %192, %192 : vector<16x64xf32>
    %194 = arith.mulf %192, %193 : vector<16x64xf32>
    %cst_63 = arith.constant 4.471500e-02 : f32
    %195 = vector.broadcast %cst_63 : f32 to vector<16x64xf32>
    %196 = arith.mulf %195, %194 : vector<16x64xf32>
    %197 = arith.addf %192, %196 : vector<16x64xf32>
    %cst_64 = arith.constant 0.797884583 : f32
    %198 = vector.broadcast %cst_64 : f32 to vector<16x64xf32>
    %199 = arith.mulf %198, %197 : vector<16x64xf32>
    %200 = math.tanh %199 : vector<16x64xf32>
    %cst_65 = arith.constant 1.000000e+00 : f32
    %201 = vector.broadcast %cst_65 : f32 to vector<16x64xf32>
    %202 = arith.addf %201, %200 : vector<16x64xf32>
    %cst_66 = arith.constant 5.000000e-01 : f32
    %203 = vector.broadcast %cst_66 : f32 to vector<16x64xf32>
    %204 = arith.mulf %203, %202 : vector<16x64xf32>
    %205 = arith.mulf %192, %204 : vector<16x64xf32>
    %206 = arith.truncf %205 : vector<16x64xf32> to vector<16x64xbf16>
    %207 = arith.truncf %17 : vector<64x32xf32> to vector<64x32xbf16>
    %cst_67 = arith.constant dense<0.000000e+00> : vector<16x32xf32>
    %208 = tpu.matmul %206, %207, %cst_67 {dimension_numbers = #tpu.dot_dimension_numbers<[1], [0], [0], [1], [0, 0, 1, 1], [], []>} : vector<16x64xbf16>, vector<64x32xbf16>, vector<16x32xf32> -> vector<16x32xf32>
    %209 = vector.broadcast %18 : vector<1x32xf32> to vector<16x32xf32>
    %210 = arith.addf %208, %209 : vector<16x32xf32>
    %211 = vector.shape_cast %210 : vector<16x32xf32> to vector<2x8x32xf32>
    %c0_68 = arith.constant 0 : index
    %c0_69 = arith.constant 0 : index
    %c0_70 = arith.constant 0 : index
    %212 = vector.load %arg20[%c0_68, %c0_69, %c0_70] : memref<2x8x32xf32, #tpu.memory_space<vmem>>, vector<2x8x32xf32>
    tpu.vector_store %arg20[%c0_68, %c0_69, %c0_70], %211 {strides = array<i32>} : memref<2x8x32xf32, #tpu.memory_space<vmem>>, vector<2x8x32xf32>,
    return
  }
  func.func @transform_0(%arg0: i32) -> (i32, i32, i32) {
    %c0_i32 = arith.constant 0 : i32
    %c0_i32_0 = arith.constant 0 : i32
    %c0_i32_1 = arith.constant 0 : i32
    return %arg0, %c0_i32, %c0_i32_0 : i32, i32, i32
  }
  func.func @transform_1(%arg0: i32) -> (i32, i32, i32) {
    %c0_i32 = arith.constant 0 : i32
    %c0_i32_0 = arith.constant 0 : i32
    %c0_i32_1 = arith.constant 0 : i32
    return %arg0, %c0_i32, %c0_i32_0 : i32, i32, i32
  }
  func.func @transform_2(%arg0: i32) -> (i32, i32) {
    %c0_i32 = arith.constant 0 : i32
    %c0_i32_0 = arith.constant 0 : i32
    %c0_i32_1 = arith.constant 0 : i32
    return %c0_i32, %c0_i32_0 : i32, i32
  }
  func.func @transform_3(%arg0: i32) -> (i32, i32) {
    %c0_i32 = arith.constant 0 : i32
    %c0_i32_0 = arith.constant 0 : i32
    %c0_i32_1 = arith.constant 0 : i32
    return %c0_i32, %c0_i32_0 : i32, i32
  }
  func.func @transform_4(%arg0: i32) -> (i32, i32) {
    %c0_i32 = arith.constant 0 : i32
    %c0_i32_0 = arith.constant 0 : i32
    %c0_i32_1 = arith.constant 0 : i32
    return %c0_i32, %c0_i32_0 : i32, i32
  }
  func.func @transform_5(%arg0: i32) -> (i32, i32) {
    %c0_i32 = arith.constant 0 : i32
    %c0_i32_0 = arith.constant 0 : i32
    %c0_i32_1 = arith.constant 0 : i32
    return %c0_i32, %c0_i32_0 : i32, i32
  }
  func.func @transform_6(%arg0: i32) -> (i32, i32) {
    %c0_i32 = arith.constant 0 : i32
    %c0_i32_0 = arith.constant 0 : i32
    %c0_i32_1 = arith.constant 0 : i32
    return %c0_i32, %c0_i32_0 : i32, i32
  }
  func.func @transform_7(%arg0: i32) -> (i32, i32) {
    %c0_i32 = arith.constant 0 : i32
    %c0_i32_0 = arith.constant 0 : i32
    %c0_i32_1 = arith.constant 0 : i32
    return %c0_i32, %c0_i32_0 : i32, i32
  }
  func.func @transform_8(%arg0: i32) -> (i32, i32) {
    %c0_i32 = arith.constant 0 : i32
    %c0_i32_0 = arith.constant 0 : i32
    %c0_i32_1 = arith.constant 0 : i32
    return %c0_i32, %c0_i32_0 : i32, i32
  }
  func.func @transform_9(%arg0: i32) -> (i32, i32) {
    %c0_i32 = arith.constant 0 : i32
    %c0_i32_0 = arith.constant 0 : i32
    %c0_i32_1 = arith.constant 0 : i32
    return %c0_i32, %c0_i32_0 : i32, i32
  }
  func.func @transform_10(%arg0: i32) -> (i32, i32) {
    %c0_i32 = arith.constant 0 : i32
    %c0_i32_0 = arith.constant 0 : i32
    %c0_i32_1 = arith.constant 0 : i32
    return %c0_i32, %c0_i32_0 : i32, i32
  }
  func.func @transform_11(%arg0: i32) -> (i32, i32) {
    %c0_i32 = arith.constant 0 : i32
    %c0_i32_0 = arith.constant 0 : i32
    %c0_i32_1 = arith.constant 0 : i32
    return %c0_i32, %c0_i32_0 : i32, i32
  }
  func.func @transform_12(%arg0: i32) -> (i32, i32) {
    %c0_i32 = arith.constant 0 : i32
    %c0_i32_0 = arith.constant 0 : i32
    %c0_i32_1 = arith.constant 0 : i32
    return %c0_i32, %c0_i32_0 : i32, i32
  }
  func.func @transform_13(%arg0: i32) -> (i32, i32) {
    %c0_i32 = arith.constant 0 : i32
    %c0_i32_0 = arith.constant 0 : i32
    %c0_i32_1 = arith.constant 0 : i32
    return %c0_i32, %c0_i32_0 : i32, i32
  }
  func.func @transform_14(%arg0: i32) -> (i32, i32) {
    %c0_i32 = arith.constant 0 : i32
    %c0_i32_0 = arith.constant 0 : i32
    %c0_i32_1 = arith.constant 0 : i32
    return %c0_i32, %c0_i32_0 : i32, i32
  }
  func.func @transform_15(%arg0: i32) -> (i32, i32) {
    %c0_i32 = arith.constant 0 : i32
    %c0_i32_0 = arith.constant 0 : i32
    %c0_i32_1 = arith.constant 0 : i32
    return %c0_i32, %c0_i32_0 : i32, i32
  }
  func.func @transform_16(%arg0: i32) -> (i32, i32) {
    %c0_i32 = arith.constant 0 : i32
    %c0_i32_0 = arith.constant 0 : i32
    %c0_i32_1 = arith.constant 0 : i32
    return %c0_i32, %c0_i32_0 : i32, i32
  }
  func.func @transform_17(%arg0: i32) -> (i32, i32) {
    %c0_i32 = arith.constant 0 : i32
    %c0_i32_0 = arith.constant 0 : i32
    %c0_i32_1 = arith.constant 0 : i32
    return %c0_i32, %c0_i32_0 : i32, i32
  }
  func.func @transform_18(%arg0: i32) -> (i32, i32) {
    %c0_i32 = arith.constant 0 : i32
    %c0_i32_0 = arith.constant 0 : i32
    %c0_i32_1 = arith.constant 0 : i32
    return %c0_i32, %c0_i32_0 : i32, i32
  }
  func.func @transform_19(%arg0: i32) -> (i32, i32, i32) {
    %c0_i32 = arith.constant 0 : i32
    %c0_i32_0 = arith.constant 0 : i32
    %c0_i32_1 = arith.constant 0 : i32
    return %arg0, %c0_i32, %c0_i32_0 : i32, i32, i32
  }
}

</mosaic_0001>

<bundles_post_ra>
// kernel: decoder_block.1
= control target key start
LH: loop header
LB: loop body
LE: loop exit
PB: predicated region body
PF: predicated region fallthrough
CT: control target
= control target key end

     0   :  { %s4753_s0 = inlined_call_operand.vmem [shape: f32[2,8,32], index: 0, kind: input, shape index: {}]   ;;  %s4754_s1 = inlined_call_operand.vmem [shape: f32[2,8,32], index: 1, kind: input, shape index: {}]   ;;  %s4755_s2 = inlined_call_operand.vmem [shape: f32[8,32], index: 2, kind: input, shape index: {}]   ;;  %s4756_s3 = inlined_call_operand.vmem [shape: f32[32,96], index: 3, kind: input, shape index: {}]   ;;  %s4757_s4 = inlined_call_operand.vmem [shape: f32[1,96], index: 4, kind: input, shape index: {}]   ;;  %s4758_s5 = inlined_call_operand.vmem [shape: f32[32,64], index: 5, kind: input, shape index: {}]   ;;  %s4759_s6 = inlined_call_operand.vmem [shape: f32[1,64], index: 6, kind: input, shape index: {}]   ;;  %s4760_s7 = inlined_call_operand.vmem [shape: f32[32,32], index: 7, kind: input, shape index: {}]   ;;  %s4761_s8 = inlined_call_operand.vmem [shape: f32[1,32], index: 8, kind: input, shape index: {}]   ;;  %s4762_s9 = inlined_call_operand.vmem [shape: f32[32,32], index: 9, kind: input, shape index: {}]   ;;  %s4763_s10 = inlined_call_operand.vmem [shape: f32[1,32], index: 10, kind: input, shape index: {}]   ;;  %s4764_s11 = inlined_call_operand.vmem [shape: f32[32,64], index: 11, kind: input, shape index: {}]   ;;  %s4765_s12 = inlined_call_operand.vmem [shape: f32[1,64], index: 12, kind: input, shape index: {}]   ;;  %s4766_s13 = inlined_call_operand.vmem [shape: f32[32,32], index: 13, kind: input, shape index: {}]   ;;  %s4767_s14 = inlined_call_operand.vmem [shape: f32[1,32], index: 14, kind: input, shape index: {}]   ;;  %s4768_s15 = inlined_call_operand.vmem [shape: f32[32,64], index: 15, kind: input, shape index: {}]   ;;  %s4769_s16 = inlined_call_operand.vmem [shape: f32[1,64], index: 16, kind: input, shape index: {}]   ;;  %s4770_s17 = inlined_call_operand.vmem [shape: f32[64,32], index: 17, kind: input, shape index: {}]   ;;  %s4771_s18 = inlined_call_operand.vmem [shape: f32[1,32], index: 18, kind: input, shape index: {}]   ;;  %s4772_s19 = inlined_call_operand.hbm [shape: f32[2,8,32], index: 19, kind: output, shape index: {}]  }
   0x1   :  { %4776 = sst [smem:[#allocation5_spill]] %s4753_s0 }
   0x2   :  { %4777 = sst [smem:[#allocation6_spill]] %s4754_s1 }
   0x3   :  { %4778 = sst [smem:[#allocation7_spill]] %s4755_s2 }
   0x4   :  { %4779 = sst [smem:[#allocation8_spill]] %s4756_s3 }
   0x5   :  { %s4780_s20 = sld [smem:[#allocation8_spill]]  ;;  %v3912_v3 = vmov 0.0   ;;  %vm3913_vm0 = vmmov 0   ;;  %s4781_s26 = sld [smem:[#allocation5_spill]] }
   0x6   :  { %3369 = vmatprep.subr.bf16.mxu0 %v3912_v3  ;;  %3373 = vmatprep.mubr.msk.bf16.mxu0 %vm3913_vm0, %v3912_v3  ;;  %s4782_s30 = sld [smem:[#allocation7_spill]] }
   0x7   :  { %3377 = vmatprep.subr.bf16.mxu1 %v3912_v3  ;;  %3379 = vmatprep.mubr.msk.bf16.mxu1 %vm3913_vm0, %v3912_v3 }
   0xb   :  { %v69_v0 = vld [vmem:[%s4780_s20] sm:$0xff]  ;;  %v70_v1 = vld [vmem:[%s4780_s20 + $0x8] sm:$0xff]  ;;  %v71_v2 = vld [vmem:[%s4780_s20 + $0x10] sm:$0xff] }
   0xc   :  { %v116_v4 = vpack.c.bf16 %v70_v1, %v69_v0  ;;  %v72_v5 = vld [vmem:[%s4780_s20 + $0x18] sm:$0xff]  ;;  %v4042_v6 = vld [vmem:[%s4781_s26] sm:$0xff]  ;;  %v4047_v7 = vld [vmem:[%s4781_s26 + $0x8] sm:$0xff] }
   0xd   :  { %v68_v8 = vld [vmem:[%s4782_s30] sm:$0xff]  ;;  %v1172_v9 = vpack.c.bf16 %v4047_v7, %v4042_v6 }
   0xe   :  { %24 = vsyncpa [#allocation3], 0  ;;  %3370 = vmatpush3.bf16.msra.mxu0 %v116_v4  ;;  %v117_v10 = vpack.c.bf16 %v72_v5, %v71_v2  ;;  %v113_v11 = vadd.f32 %v68_v8, %v4042_v6  ;;  %v114_v12 = vadd.f32 %v68_v8, %v4047_v7  ;;  %vm124_vm1 = vcmask 261120   ;;  %v3195_v16 = vld [vmem:[%s4757_s4] ss:$0 sm:$0xff]  ;;  %s3914_s1 = smov 104  }
   0xf   :  { %3371 = vmatprep.subr.bf16.mxu0 %v3912_v3  ;;  %s3915_s22 = smov 120   ;;  %s3916_s2 = smov 112   ;;  %vm200_vm2 = vcmask 64512   ;;  %vm707_vm3 = vcmask 1043456   ;;  %vm1113_vm4 = vcmask 130048   ;;  %vm1116_vm5 = vcmask 195584  }
  0x10   :  { %v115_v13 = vpack.c.bf16 %v114_v12, %v113_v11  ;;  %s3917_s23 = smov 96   ;;  %s3918_s4 = smov 64   ;;  %vm3132_vm6 = vcmask 523264  }
  0x11   :  { %s3919_s27 = smov 8   ;;  %s3920_s28 = smov 16  }
  0x12   :  { %3372 = vmatpush3.bf16.msra.mxu0 %v117_v10 }
  0x13   :  { %3383 = vmatprep.subr.bf16.mxu0 %v3912_v3 }
  0x15   :  { %3374 = vmatmul.mubr.msk.bf16.vlgmr.msra.gmra.mrb[0].mxu0 %vm124_vm1, %v115_v13 }
  0x16   :  { %3385 = vmatprep.mubr.msk.bf16.mxu0 %vm3913_vm0, %v3912_v3 }
  0xe8   :  { %v162_v14 = vpop.f32.mrb[0].mxu0 }
  0xe9   :  { %v3375_v15 = vpop.f32.mrb[1].mxu0  ;;  %v163_v21 = vadd.f32 %v3195_v16, %v162_v14 }
  0xea   :  { %v165_v17 = vpop.f32.mrb[2].mxu0 }
  0xeb   :  { %v166_v18 = vadd.f32 %v3195_v16, %v165_v17  ;;  %v3376_v19 = vpop.f32.mrb[3].mxu0  ;;  %v4097_v33 = vpack.c.bf16 %v163_v21, %v163_v21 }
  0xed   :  { %185 = vrot.lane.b32.xlu1 %v166_v18, %s3914_s1  ;;  %173 = vrot.lane.b32.xlu0 %v166_v18, %s3915_s22  ;;  %v4069_v20 = vpack.c.bf16 %v166_v18, %v166_v18 }
  0xf1   :  { %179 = vrot.lane.b32.xlu0 %v166_v18, %s3916_s2  ;;  %248 = vrot.lane.b32.xlu1 %v4069_v20, %s3917_s23 }
  0xf5   :  { %171 = vrot.lane.b32.xlu1 %v163_v21, %s3915_s22 }
  0xf9   :  { %177 = vrot.lane.b32.xlu1 %v163_v21, %s3916_s2 }
  0xfd   :  { %183 = vrot.lane.b32.xlu1 %v163_v21, %s3914_s1 }
 0x15f   :  { %v186_v22 = vpop.permute.xlu1 %185  ;;  %v174_v23 = vpop.permute.xlu0 %173 }
 0x160   :  { %v4077_v24 = vpack.c.bf16 %v174_v23, %v174_v23  ;;  %v4087_v30 = vpack.c.bf16 %v186_v22, %v186_v22 }
 0x162   :  { %346 = vrot.lane.b32.xlu0 %v4077_v24, %s3917_s23 }
 0x163   :  { %v180_v25 = vpop.permute.xlu0 %179  ;;  %v249_v26 = vpop.permute.xlu1 %248 }
 0x164   :  { %v4081_v27 = vpack.c.bf16 %v180_v25, %v180_v25  ;;  %v254_v28 = vsel %vm200_vm2, %v249_v26, 0 }
 0x165   :  { %3384 = vmatpush3.bf16.xpose.msra.mxu0 %v254_v28 }
 0x166   :  { %444 = vrot.lane.b32.xlu0 %v4081_v27, %s3917_s23  ;;  %3395 = vmatprep.subr.bf16.mxu0 %v3912_v3 }
 0x167   :  { %v172_v29 = vpop.permute.xlu1 %171 }
 0x168   :  { %v4089_v31 = vpack.c.bf16 %v172_v29, %v172_v29 }
 0x16a   :  { %542 = vrot.lane.b32.xlu0 %v4087_v30, %s3917_s23  ;;  %297 = vrot.lane.b32.xlu1 %v4089_v31, %s3917_s23 }
 0x16b   :  { %v178_v32 = vpop.permute.xlu1 %177 }
 0x16c   :  { %3386 = vmatmul.mubr.msk.bf16.vlgmr.msra.gmra.mrb[4].mxu0 %vm200_vm2, %v4069_v20  ;;  %v4103_v35 = vpack.c.bf16 %v178_v32, %v178_v32 }
 0x16d   :  { %3397 = vmatprep.mubr.msk.bf16.mxu0 %vm3913_vm0, %v3912_v3 }
 0x16e   :  { %198 = vrot.lane.b32.xlu0 %v4097_v33, %s3917_s23 }
 0x16f   :  { %v184_v34 = vpop.permute.xlu1 %183 }
 0x170   :  { %v4105_v36 = vpack.c.bf16 %v184_v34, %v184_v34 }
 0x172   :  { %395 = vrot.lane.b32.xlu0 %v4103_v35, %s3917_s23  ;;  %493 = vrot.lane.b32.xlu1 %v4105_v36, %s3917_s23 }
 0x1d4   :  { %v347_v37 = vpop.permute.xlu0 %346 }
 0x1d5   :  { %v352_v38 = vsel %vm200_vm2, %v347_v37, 0 }
 0x1d6   :  { %3396 = vmatpush3.bf16.xpose.msra.mxu0 %v352_v38 }
 0x1d7   :  { %3407 = vmatprep.subr.bf16.mxu0 %v3912_v3 }
 0x1d8   :  { %v445_v39 = vpop.permute.xlu0 %444 }
 0x1d9   :  { %v450_v41 = vsel %vm200_vm2, %v445_v39, 0 }
 0x1dc   :  { %v543_v40 = vpop.permute.xlu0 %542  ;;  %v298_v45 = vpop.permute.xlu1 %297 }
 0x1dd   :  { %3398 = vmatmul.mubr.msk.bf16.vlgmr.msra.gmra.mrb[8].mxu0 %vm200_vm2, %v4077_v24  ;;  %v548_v44 = vsel %vm200_vm2, %v543_v40, 0  ;;  %v303_v46 = vsel %vm200_vm2, %v298_v45, 0 }
 0x1de   :  { %3408 = vmatpush3.bf16.xpose.msra.mxu0 %v450_v41  ;;  %3409 = vmatprep.mubr.msk.bf16.mxu0 %vm3913_vm0, %v3912_v3 }
 0x1df   :  { %3419 = vmatprep.subr.bf16.mxu0 %v3912_v3 }
 0x1e0   :  { %v199_v42 = vpop.permute.xlu0 %198 }
 0x1e1   :  { %v205_v43 = vsel %vm200_vm2, %v199_v42, 0 }
 0x1e2   :  { %3378 = vmatpush3.bf16.xpose.msra.mxu1 %v205_v43 }
 0x1e3   :  { %3389 = vmatprep.subr.bf16.mxu1 %v3912_v3 }
 0x1e4   :  { %v396_v47 = vpop.permute.xlu0 %395  ;;  %v494_v49 = vpop.permute.xlu1 %493 }
 0x1e5   :  { %3410 = vmatmul.mubr.msk.bf16.vlgmr.msra.gmra.mrb[12].mxu0 %vm200_vm2, %v4081_v27  ;;  %v401_v48 = vsel %vm200_vm2, %v396_v47, 0  ;;  %v499_v50 = vsel %vm200_vm2, %v494_v49, 0 }
 0x1e6   :  { %3420 = vmatpush3.bf16.xpose.msra.mxu0 %v548_v44  ;;  %3421 = vmatprep.mubr.msk.bf16.mxu0 %vm3913_vm0, %v3912_v3 }
 0x1e7   :  { %3431 = vmatprep.subr.bf16.mxu0 %v3912_v3 }
 0x1e9   :  { %3380 = vmatmul.mubr.msk.bf16.vlgmr.msra.gmra.mrb[0].mxu1 %vm200_vm2, %v4097_v33 }
 0x1ea   :  { %3390 = vmatpush3.bf16.xpose.msra.mxu1 %v303_v46  ;;  %3391 = vmatprep.mubr.msk.bf16.mxu1 %vm3913_vm0, %v3912_v3 }
 0x1eb   :  { %3401 = vmatprep.subr.bf16.mxu1 %v3912_v3 }
 0x1ed   :  { %3422 = vmatmul.mubr.msk.bf16.vlgmr.msra.gmra.mrb[16].mxu0 %vm200_vm2, %v4087_v30 }
 0x1ee   :  { %3433 = vmatprep.mubr.msk.bf16.mxu0 %vm3913_vm0, %v3912_v3 }
 0x1f1   :  { %3392 = vmatmul.mubr.msk.bf16.vlgmr.msra.gmra.mrb[4].mxu1 %vm200_vm2, %v4089_v31 }
 0x1f2   :  { %3402 = vmatpush3.bf16.xpose.msra.mxu1 %v401_v48  ;;  %3403 = vmatprep.mubr.msk.bf16.mxu1 %vm3913_vm0, %v3912_v3 }
 0x1f3   :  { %3413 = vmatprep.subr.bf16.mxu1 %v3912_v3 }
 0x1f9   :  { %3404 = vmatmul.mubr.msk.bf16.vlgmr.msra.gmra.mrb[8].mxu1 %vm200_vm2, %v4103_v35 }
 0x1fa   :  { %3414 = vmatpush3.bf16.xpose.msra.mxu1 %v499_v50  ;;  %3415 = vmatprep.mubr.msk.bf16.mxu1 %vm3913_vm0, %v3912_v3 }
 0x1fb   :  { %3425 = vmatprep.subr.bf16.mxu1 %v3912_v3 }
 0x201   :  { %3416 = vmatmul.mubr.msk.bf16.vlgmr.msra.gmra.mrb[12].mxu1 %vm200_vm2, %v4105_v36 }
 0x202   :  { %3427 = vmatprep.mubr.msk.bf16.mxu1 %vm3913_vm0, %v3912_v3 }
 0x23f   :  { %v290_v51 = vpop.f32.mrb[4].mxu0 }
 0x240   :  { %v591_v52 = vmul.f32 0.35355338, %v290_v51  ;;  %v3387_v53 = vpop.f32.mrb[5].mxu0 }
 0x241   :  { %v293_v54 = vpop.f32.mrb[6].mxu0 }
 0x242   :  { %v3388_v55 = vpop.f32.mrb[7].mxu0  ;;  %v601_v56 = vsel %vm200_vm2, %v591_v52, -inf }
 0x243   :  { %602 = vmax.xlane.f32.xlu0 %v601_v56 }
 0x2b0   :  { %v388_v57 = vpop.f32.mrb[8].mxu0 }
 0x2b1   :  { %v593_v58 = vmul.f32 0.35355338, %v388_v57  ;;  %v3399_v59 = vpop.f32.mrb[9].mxu0 }
 0x2b2   :  { %v391_v60 = vpop.f32.mrb[10].mxu0 }
 0x2b3   :  { %v3400_v61 = vpop.f32.mrb[11].mxu0  ;;  %v607_v62 = vsel %vm200_vm2, %v593_v58, -inf }
 0x2b4   :  { %608 = vmax.xlane.f32.xlu1 %v607_v62 }
 0x2b8   :  { %v486_v63 = vpop.f32.mrb[12].mxu0 }
 0x2b9   :  { %v595_v0 = vmul.f32 0.35355338, %v486_v63  ;;  %v3411_v1 = vpop.f32.mrb[13].mxu0 }
 0x2ba   :  { %v489_v2 = vpop.f32.mrb[14].mxu0 }
 0x2bb   :  { %v3412_v4 = vpop.f32.mrb[15].mxu0  ;;  %v613_v5 = vsel %vm200_vm2, %v595_v0, -inf }
 0x2bc   :  { %v241_v8 = vpop.f32.mrb[0].mxu1  ;;  %614 = vmax.xlane.f32.xlu0 %v613_v5 }
 0x2bd   :  { %v4156_v10 = vmul.f32 0.35355338, %v241_v8  ;;  %v3381_v11 = vpop.f32.mrb[1].mxu1 }
 0x2be   :  { %v244_v12 = vpop.f32.mrb[2].mxu1 }
 0x2bf   :  { %v3382_v13 = vpop.f32.mrb[3].mxu1  ;;  %v598_v14 = vsel %vm200_vm2, %v4156_v10, -inf }
 0x2c0   :  { %599 = vmax.xlane.f32.xlu1 %v598_v14  ;;  %v584_v15 = vpop.f32.mrb[16].mxu0 }
 0x2c1   :  { %v597_v16 = vmul.f32 0.35355338, %v584_v15  ;;  %v3423_v17 = vpop.f32.mrb[17].mxu0 }
 0x2c2   :  { %v587_v18 = vpop.f32.mrb[18].mxu0 }
 0x2c3   :  { %v3424_v19 = vpop.f32.mrb[19].mxu0  ;;  %v619_v21 = vsel %vm200_vm2, %v597_v16, -inf }
 0x2c4   :  { %v339_v22 = vpop.f32.mrb[4].mxu1  ;;  %620 = vmax.xlane.f32.xlu0 %v619_v21 }
 0x2c5   :  { %v4161_v23 = vmul.f32 0.35355338, %v339_v22  ;;  %v3393_v25 = vpop.f32.mrb[5].mxu1 }
 0x2c6   :  { %v342_v26 = vpop.f32.mrb[6].mxu1 }
 0x2c7   :  { %v3394_v28 = vpop.f32.mrb[7].mxu1  ;;  %v604_v29 = vsel %vm200_vm2, %v4161_v23, -inf }
 0x2c8   :  { %605 = vmax.xlane.f32.xlu0 %v604_v29 }
 0x2cc   :  { %v437_v32 = vpop.f32.mrb[8].mxu1 }
 0x2cd   :  { %v594_v34 = vmul.f32 0.35355338, %v437_v32  ;;  %v3405_v37 = vpop.f32.mrb[9].mxu1 }
 0x2ce   :  { %v440_v38 = vpop.f32.mrb[10].mxu1 }
 0x2cf   :  { %v3406_v39 = vpop.f32.mrb[11].mxu1  ;;  %v610_v40 = vsel %vm200_vm2, %v594_v34, -inf }
 0x2d0   :  { %611 = vmax.xlane.f32.xlu1 %v610_v40  ;;  %v603_v47 = vpop.xlane.xlu0 %602 }
 0x2d1   :  { %v623_v48 = vsub.f32 %v591_v52, %v603_v47 }
 0x2d3   :  { %v632_v49 = vmul.f32 1.442695, %v623_v48 }
 0x2d4   :  { %v535_v41 = vpop.f32.mrb[12].mxu1 }
 0x2d5   :  { %v596_v42 = vmul.f32 0.35355338, %v535_v41  ;;  %v3417_v43 = vpop.f32.mrb[13].mxu1  ;;  %3788 = vpow2.f32 %v632_v49 }
 0x2d6   :  { %v538_v44 = vpop.f32.mrb[14].mxu1 }
 0x2d7   :  { %v3418_v45 = vpop.f32.mrb[15].mxu1  ;;  %v616_v46 = vsel %vm200_vm2, %v596_v42, -inf }
 0x2d8   :  { %617 = vmax.xlane.f32.xlu0 %v616_v46 }
 0x2df   :  { %v3789_v50 = vpop.eup %3788 }
 0x2e0   :  { %v649_v51 = vsel %vm200_vm2, %v3789_v50, 0.0 }
 0x2e1   :  { %751 = vrot.lane.b32.xlu1 %v4069_v20, %s3918_s4 }
 0x305   :  { %650 = vadd.xlane.f32.xlu1 %v649_v51 }
 0x341   :  { %v609_v53 = vpop.xlane.xlu1 %608 }
 0x342   :  { %v625_v54 = vsub.f32 %v593_v58, %v609_v53 }
 0x344   :  { %v636_v55 = vmul.f32 1.442695, %v625_v54  ;;  %v74_v54 = vld [vmem:[%s4758_s5] sm:$0xff] }
 0x346   :  { %3790 = vpow2.f32 %v636_v55  ;;  %v75_v55 = vld [vmem:[%s4758_s5 + $0x8] sm:$0xff] }
 0x349   :  { %v615_v56 = vpop.xlane.xlu0 %614 }
 0x34a   :  { %v627_v57 = vsub.f32 %v595_v0, %v615_v56  ;;  %v1173_v56 = vpack.c.bf16 %v75_v55, %v74_v54  ;;  %v79_v54 = vld [vmem:[%s4760_s7] sm:$0xff]  ;;  %v80_v55 = vld [vmem:[%s4760_s7 + $0x8] sm:$0xff] }
 0x34c   :  { %v640_v59 = vmul.f32 1.442695, %v627_v57 }
 0x34d   :  { %v600_v1 = vpop.xlane.xlu1 %599 }
 0x34e   :  { %3792 = vpow2.f32 %v640_v59  ;;  %v622_v13 = vsub.f32 %v4156_v10, %v600_v1  ;;  %v76_v59 = vld [vmem:[%s4758_s5 + $0x10] sm:$0xff] }
 0x350   :  { %v4170_v60 = vpop.eup %3790  ;;  %v630_v15 = vmul.f32 1.442695, %v622_v13 }
 0x351   :  { %v621_v61 = vpop.xlane.xlu0 %620  ;;  %v655_v20 = vsel %vm200_vm2, %v4170_v60, 0.0 }
 0x352   :  { %v629_v52 = vsub.f32 %v597_v16, %v621_v61  ;;  %656 = vadd.xlane.f32.xlu0 %v655_v20 }
 0x354   :  { %v644_v62 = vmul.f32 1.442695, %v629_v52 }
 0x355   :  { %v606_v11 = vpop.xlane.xlu0 %605 }
 0x356   :  { %3794 = vpow2.f32 %v644_v62  ;;  %v624_v12 = vsub.f32 %v4161_v23, %v606_v11 }
 0x358   :  { %v3793_v63 = vpop.eup %3792  ;;  %v634_v14 = vmul.f32 1.442695, %v624_v12 }
 0x359   :  { %v661_v58 = vsel %vm200_vm2, %v3793_v63, 0.0 }
 0x35a   :  { %662 = vadd.xlane.f32.xlu1 %v661_v58  ;;  %3796 = vpow2.f32 %v634_v14 }
 0x35b   :  { %3798 = vpow2.f32 %v630_v15 }
 0x35d   :  { %v612_v2 = vpop.xlane.xlu1 %611 }
 0x35e   :  { %v626_v16 = vsub.f32 %v594_v34, %v612_v2 }
 0x360   :  { %v4175_v0 = vpop.eup %3794  ;;  %v638_v18 = vmul.f32 1.442695, %v626_v16 }
 0x361   :  { %v752_v4 = vpop.permute.xlu1 %751  ;;  %v667_v5 = vsel %vm200_vm2, %v4175_v0, 0.0 }
 0x362   :  { %v757_v8 = vsel %vm707_vm3, %v752_v4, 0  ;;  %668 = vadd.xlane.f32.xlu0 %v667_v5  ;;  %3800 = vpow2.f32 %v638_v18 }
 0x363   :  { %3432 = vmatpush3.bf16.msra.mxu0 %v757_v8 }
 0x364   :  { %3443 = vmatprep.subr.bf16.mxu0 %v3912_v3  ;;  %v4189_v21 = vpop.eup %3796 }
 0x365   :  { %v618_v17 = vpop.xlane.xlu0 %617  ;;  %v4193_v22 = vpop.eup %3798 }
 0x366   :  { %v628_v19 = vsub.f32 %v596_v42, %v618_v17  ;;  %v646_v10 = vsel %vm200_vm2, %v4193_v22, 0.0 }
 0x36b   :  { %943 = vrot.lane.b32.xlu1 %v4081_v27, %s3918_s4  ;;  %v642_v27 = vmul.f32 1.442695, %v628_v19 }
 0x36c   :  { %v4197_v23 = vpop.eup %3800 }
 0x36d   :  { %3802 = vpow2.f32 %v642_v27  ;;  %v658_v25 = vsel %vm200_vm2, %v4197_v23, 0.0 }
 0x36f   :  { %1039 = vrot.lane.b32.xlu1 %v4087_v30, %s3918_s4 }
 0x377   :  { %v4201_v26 = vpop.eup %3802 }
 0x378   :  { %847 = vrot.lane.b32.xlu0 %v4077_v24, %s3918_s4  ;;  %v652_v24 = vsel %vm200_vm2, %v4189_v21, 0.0  ;;  %v664_v32 = vsel %vm200_vm2, %v4201_v26, 0.0 }
 0x392   :  { %v651_v30 = vpop.xlane.xlu1 %650 }
 0x393   :  { %3804 = vrcp.f32 %v651_v30  ;;  %653 = vadd.xlane.f32.xlu1 %v652_v24 }
 0x397   :  { %647 = vadd.xlane.f32.xlu0 %v646_v10 }
 0x39b   :  { %659 = vadd.xlane.f32.xlu0 %v658_v25 }
 0x39d   :  { %v3805_v28 = vpop.eup %3804 }
 0x39e   :  { %v679_v29 = vmul.f32 %v3805_v28, %v3789_v50 }
 0x39f   :  { %665 = vadd.xlane.f32.xlu0 %v664_v32 }
 0x3a0   :  { %v695_v34 = vpack.c.bf16 %v679_v29, %v679_v29 }
 0x3a2   :  { %3434 = vmatmul.mubr.msk.bf16.vlgmr.msra.gmra.mrb[20].mxu0 %vm200_vm2, %v695_v34 }
 0x3a3   :  { %3445 = vmatprep.mubr.msk.bf16.mxu0 %vm3913_vm0, %v3912_v3 }
 0x3a4   :  { %702 = vrot.lane.b32.xlu1 %v4097_v33, %s3918_s4 }
 0x3a8   :  { %895 = vrot.lane.b32.xlu1 %v4103_v35, %s3918_s4 }
 0x3ac   :  { %991 = vrot.lane.b32.xlu1 %v4105_v36, %s3918_s4 }
 0x3b5   :  { %799 = vrot.lane.b32.xlu0 %v4089_v31, %s3918_s4 }
 0x3df   :  { %v657_v37 = vpop.xlane.xlu0 %656 }
 0x3e0   :  { %3806 = vrcp.f32 %v657_v37 }
 0x3e7   :  { %v663_v38 = vpop.xlane.xlu1 %662 }
 0x3e8   :  { %3808 = vrcp.f32 %v663_v38 }
 0x3ea   :  { %v3807_v39 = vpop.eup %3806 }
 0x3eb   :  { %v681_v40 = vmul.f32 %v3807_v39, %v4170_v60  ;;  %v944_v45 = vpop.permute.xlu1 %943  ;;  %v77_v60 = vld [vmem:[%s4758_s5 + $0x18] sm:$0xff]  ;;  %s4783_s5 = sld [smem:[#allocation6_spill]] }
 0x3ec   :  { %v949_v31 = vsel %vm707_vm3, %v944_v45, 0  ;;  %v1174_v61 = vpack.c.bf16 %v77_v60, %v76_v59  ;;  %v81_v59 = vld [vmem:[%s4760_s7 + $0x10] sm:$0xff]  ;;  %v82_v60 = vld [vmem:[%s4760_s7 + $0x18] sm:$0xff]  ;;  %s3921_s7 = smov 24  }
 0x3ed   :  { %v687_v44 = vadd.f32 %v681_v40, %v679_v29  ;;  %v697_v46 = vpack.c.bf16 %v681_v40, %v681_v40 }
 0x3ef   :  { %v669_v41 = vpop.xlane.xlu0 %668  ;;  %v1040_v49 = vpop.permute.xlu1 %1039 }
 0x3f0   :  { %3810 = vrcp.f32 %v669_v41  ;;  %v1045_v53 = vsel %vm707_vm3, %v1040_v49, 0 }
 0x3f2   :  { %v3809_v42 = vpop.eup %3808 }
 0x3f3   :  { %v683_v33 = vmul.f32 %v3809_v42, %v3793_v63  ;;  %v848_v43 = vpop.permute.xlu0 %847 }
 0x3f4   :  { %v853_v35 = vsel %vm707_vm3, %v848_v43, 0  ;;  %v3215_v43 = vld [vmem:[%s4759_s6] ss:$0 sm:$0xff] }
 0x3f5   :  { %3444 = vmatpush3.bf16.msra.mxu0 %v853_v35  ;;  %v689_v36 = vadd.f32 %v687_v44, %v683_v33  ;;  %v699_v51 = vpack.c.bf16 %v683_v33, %v683_v33 }
 0x3f6   :  { %3455 = vmatprep.subr.bf16.mxu0 %v3912_v3 }
 0x3f8   :  { %3446 = vmatmul.mubr.msk.bf16.vlgmr.msra.gmra.mrb[24].mxu0 %vm200_vm2, %v697_v46 }
 0x3f9   :  { %3456 = vmatpush3.bf16.msra.mxu0 %v949_v31  ;;  %3457 = vmatprep.mubr.msk.bf16.mxu0 %vm3913_vm0, %v3912_v3 }
 0x3fa   :  { %v3811_v47 = vpop.eup %3810  ;;  %3467 = vmatprep.subr.bf16.mxu0 %v3912_v3 }
 0x3fb   :  { %v685_v48 = vmul.f32 %v3811_v47, %v4175_v0 }
 0x3fd   :  { %v4225_v50 = vadd.f32 %v689_v36, %v685_v48  ;;  %v701_v57 = vpack.c.bf16 %v685_v48, %v685_v48 }
 0x400   :  { %3458 = vmatmul.mubr.msk.bf16.vlgmr.msra.gmra.mrb[28].mxu0 %vm200_vm2, %v699_v51 }
 0x401   :  { %3468 = vmatpush3.bf16.msra.mxu0 %v1045_v53  ;;  %3469 = vmatprep.mubr.msk.bf16.mxu0 %vm3913_vm0, %v3912_v3 }
 0x402   :  { %3481 = vmatprep.subr.bf16.mxu0 %v3912_v3 }
 0x408   :  { %3470 = vmatmul.mubr.msk.bf16.vlgmr.msra.gmra.mrb[32].mxu0 %vm200_vm2, %v701_v57 }
 0x409   :  { %3482 = vmatpush3.bf16.msra.mxu0 %v1173_v56  ;;  %3485 = vmatprep.mubr.msk.bf16.mxu0 %vm3913_vm0, %v3912_v3  ;;  %v1120_v56 = vpack.c.bf16 %v80_v55, %v79_v54 }
 0x40a   :  { %3483 = vmatprep.subr.bf16.mxu0 %v3912_v3 }
 0x40d   :  { %3484 = vmatpush3.bf16.msra.mxu0 %v1174_v61 }
 0x40e   :  { %3495 = vmatprep.subr.bf16.mxu0 %v3912_v3 }
 0x410   :  { %3486 = vmatmul.mubr.msk.bf16.vlgmr.msra.gmra.mrb[36].mxu0 %vm124_vm1, %v1172_v9 }
 0x411   :  { %3497 = vmatprep.mubr.msk.bf16.mxu0 %vm3913_vm0, %v3912_v3 }
 0x420   :  { %v654_v20 = vpop.xlane.xlu1 %653 }
 0x421   :  { %3812 = vrcp.f32 %v654_v20 }
 0x424   :  { %v703_v52 = vpop.permute.xlu1 %702  ;;  %v648_v62 = vpop.xlane.xlu0 %647 }
 0x425   :  { %v709_v63 = vsel %vm707_vm3, %v703_v52, 0  ;;  %3814 = vrcp.f32 %v648_v62  ;;  %v1121_v52 = vpack.c.bf16 %v82_v60, %v81_v59 }
 0x426   :  { %3426 = vmatpush3.bf16.msra.mxu1 %v709_v63 }
 0x427   :  { %3437 = vmatprep.subr.bf16.mxu1 %v3912_v3 }
 0x428   :  { %v660_v1 = vpop.xlane.xlu0 %659  ;;  %v896_v16 = vpop.permute.xlu1 %895 }
 0x429   :  { %3816 = vrcp.f32 %v660_v1  ;;  %v901_v19 = vsel %vm707_vm3, %v896_v16, 0 }
 0x42b   :  { %v3813_v2 = vpop.eup %3812 }
 0x42c   :  { %v666_v58 = vpop.xlane.xlu0 %665  ;;  %v680_v7 = vmul.f32 %v3813_v2, %v4189_v21  ;;  %v992_v27 = vpop.permute.xlu1 %991 }
 0x42d   :  { %3818 = vrcp.f32 %v666_v58  ;;  %v997_v30 = vsel %vm707_vm3, %v992_v27, 0 }
 0x42e   :  { %v696_v17 = vpack.c.bf16 %v680_v7, %v680_v7 }
 0x42f   :  { %v3815_v6 = vpop.eup %3814 }
 0x430   :  { %v678_v9 = vmul.f32 %v3815_v6, %v4193_v22  ;;  %v800_v0 = vpop.permute.xlu0 %799 }
 0x431   :  { %v805_v12 = vsel %vm707_vm3, %v800_v0, 0 }
 0x432   :  { %v694_v4 = vpack.c.bf16 %v678_v9, %v678_v9  ;;  %v686_v5 = vadd.f32 %v680_v7, %v678_v9 }
 0x433   :  { %v3817_v8 = vpop.eup %3816 }
 0x434   :  { %v682_v11 = vmul.f32 %v3817_v8, %v4197_v23  ;;  %3428 = vmatmul.mubr.msk.bf16.vlgmr.msra.gmra.mrb[16].mxu1 %vm200_vm2, %v694_v4 }
 0x435   :  { %3438 = vmatpush3.bf16.msra.mxu1 %v805_v12  ;;  %3439 = vmatprep.mubr.msk.bf16.mxu1 %vm3913_vm0, %v3912_v3 }
 0x436   :  { %3449 = vmatprep.subr.bf16.mxu1 %v3912_v3  ;;  %v688_v13 = vadd.f32 %v686_v5, %v682_v11  ;;  %v698_v21 = vpack.c.bf16 %v682_v11, %v682_v11 }
 0x437   :  { %v3819_v14 = vpop.eup %3818 }
 0x438   :  { %v684_v15 = vmul.f32 %v3819_v14, %v4201_v26 }
 0x43a   :  { %v4266_v18 = vadd.f32 %v688_v13, %v684_v15  ;;  %v700_v24 = vpack.c.bf16 %v684_v15, %v684_v15 }
 0x43c   :  { %3440 = vmatmul.mubr.msk.bf16.vlgmr.msra.gmra.mrb[20].mxu1 %vm200_vm2, %v696_v17 }
 0x43d   :  { %3450 = vmatpush3.bf16.msra.mxu1 %v901_v19  ;;  %3451 = vmatprep.mubr.msk.bf16.mxu1 %vm3913_vm0, %v3912_v3 }
 0x43e   :  { %3461 = vmatprep.subr.bf16.mxu1 %v3912_v3 }
 0x444   :  { %3452 = vmatmul.mubr.msk.bf16.vlgmr.msra.gmra.mrb[24].mxu1 %vm200_vm2, %v698_v21 }
 0x445   :  { %3462 = vmatpush3.bf16.msra.mxu1 %v997_v30  ;;  %3463 = vmatprep.mubr.msk.bf16.mxu1 %vm3913_vm0, %v3912_v3 }
 0x446   :  { %3473 = vmatprep.subr.bf16.mxu1 %v3912_v3 }
 0x44c   :  { %3464 = vmatmul.mubr.msk.bf16.vlgmr.msra.gmra.mrb[28].mxu1 %vm200_vm2, %v700_v24 }
 0x44d   :  { %3477 = vmatprep.mubr.msk.bf16.mxu1 %vm3913_vm0, %v3912_v3  ;;  %3474 = vmatpush3.bf16.msra.mxu1 %v1120_v56 }
 0x44e   :  { %3475 = vmatprep.subr.bf16.mxu1 %v3912_v3 }
 0x451   :  { %3476 = vmatpush3.bf16.msra.mxu1 %v1121_v52 }
 0x452   :  { %3489 = vmatprep.subr.bf16.mxu1 %v3912_v3 }
 0x475   :  { %v4281_v22 = vpop.f32.mrb[20].mxu0 }
 0x476   :  { %v3435_v10 = vpop.f32.mrb[21].mxu0 }
 0x477   :  { %v796_v23 = vpop.f32.mrb[22].mxu0 }
 0x478   :  { %v3436_v25 = vpop.f32.mrb[23].mxu0 }
 0x4cb   :  { %v889_v26 = vpop.f32.mrb[24].mxu0 }
 0x4cc   :  { %v3447_v28 = vpop.f32.mrb[25].mxu0 }
 0x4cd   :  { %v892_v29 = vpop.f32.mrb[26].mxu0 }
 0x4ce   :  { %v3448_v32 = vpop.f32.mrb[27].mxu0 }
 0x4d3   :  { %v985_v34 = vpop.f32.mrb[28].mxu0 }
 0x4d4   :  { %v3459_v37 = vpop.f32.mrb[29].mxu0 }
 0x4d5   :  { %v988_v38 = vpop.f32.mrb[30].mxu0 }
 0x4d6   :  { %v3460_v39 = vpop.f32.mrb[31].mxu0 }
 0x4db   :  { %v1081_v40 = vpop.f32.mrb[32].mxu0 }
 0x4dc   :  { %v3471_v41 = vpop.f32.mrb[33].mxu0 }
 0x4dd   :  { %v1084_v42 = vpop.f32.mrb[34].mxu0 }
 0x4de   :  { %v3472_v33 = vpop.f32.mrb[35].mxu0 }
 0x4e3   :  { %v1218_v44 = vpop.f32.mrb[36].mxu0 }
 0x4e4   :  { %v3487_v35 = vpop.f32.mrb[37].mxu0  ;;  %v1219_v36 = vadd.f32 %v3215_v43, %v1218_v44 }
 0x4e5   :  { %v1221_v45 = vpop.f32.mrb[38].mxu0 }
 0x4e6   :  { %v1222_v46 = vadd.f32 %v3215_v43, %v1221_v45  ;;  %v3488_v31 = vpop.f32.mrb[39].mxu0  ;;  %v1245_v9 = vpack.c.bf16 %v1219_v36, %v1219_v36 }
 0x4e8   :  { %v3713_v47 = vpack.i.bf16 %v1222_v46, %v1219_v36  ;;  %v1246_v12 = vpack.c.bf16 %v1222_v46, %v1222_v46 }
 0x4ea   :  { %3714 = vrot.lane.b32.xlu0 %v3713_v47, %s3915_s22  ;;  %3719 = vrot.lane.b32.xlu1 %v3713_v47, %s3916_s2 }
 0x4ee   :  { %3724 = vrot.lane.b32.xlu0 %v3713_v47, %s3914_s1 }
 0x507   :  { %v4289_v48 = vpop.f32.mrb[16].mxu1 }
 0x508   :  { %v3429_v49 = vpop.f32.mrb[17].mxu1 }
 0x509   :  { %v748_v51 = vpop.f32.mrb[18].mxu1 }
 0x50a   :  { %v3430_v53 = vpop.f32.mrb[19].mxu1 }
 0x50f   :  { %v841_v57 = vpop.f32.mrb[20].mxu1 }
 0x510   :  { %v3728_v61 = vpack.i.bf16 %v889_v26, %v841_v57  ;;  %v3441_v20 = vpop.f32.mrb[21].mxu1 }
 0x511   :  { %v844_v62 = vpop.f32.mrb[22].mxu1 }
 0x512   :  { %v3442_v63 = vpop.f32.mrb[23].mxu1  ;;  %3729 = vrot.lane.b32.xlu1 %v3728_v61, %s3919_s27  ;;  %v692_v62 = vmul.f32 0.25, %v4266_v18 }
 0x513   :  { %v693_v63 = vmul.f32 0.25, %v4225_v50 }
 0x517   :  { %v937_v1 = vpop.f32.mrb[24].mxu1 }
 0x518   :  { %v3733_v58 = vpack.i.bf16 %v985_v34, %v937_v1  ;;  %v3453_v2 = vpop.f32.mrb[25].mxu1  ;;  %v1751_v1 = vpack.c.bf16 %v692_v62, %v692_v62 }
 0x519   :  { %v940_v6 = vpop.f32.mrb[26].mxu1 }
 0x51a   :  { %v3454_v7 = vpop.f32.mrb[27].mxu1  ;;  %3734 = vrot.lane.b32.xlu0 %v3733_v58, %s3920_s28  ;;  %v1752_v58 = vpack.c.bf16 %v693_v63, %v693_v63  ;;  %v1757_v50 = vsel %vm707_vm3, %v1751_v1, 0 }
 0x51c   :  { %v1803_v18 = vsel %vm707_vm3, %v1752_v58, 0 }
 0x51e   :  { %1254 = vrot.lane.b32.xlu0 %v1245_v9, %s3917_s23 }
 0x51f   :  { %v1033_v0 = vpop.f32.mrb[28].mxu1 }
 0x520   :  { %v3738_v4 = vpack.i.bf16 %v1081_v40, %v1033_v0  ;;  %v3465_v5 = vpop.f32.mrb[29].mxu1 }
 0x521   :  { %v1036_v8 = vpop.f32.mrb[30].mxu1 }
 0x522   :  { %v3466_v11 = vpop.f32.mrb[31].mxu1  ;;  %3739 = vrot.lane.b32.xlu1 %v3738_v4, %s3921_s7 }
 0x526   :  { %1303 = vrot.lane.b32.xlu1 %v1246_v12, %s3917_s23 }
 0x55c   :  { %v3715_v13 = vpop.permute.xlu0 %3714  ;;  %v3720_v14 = vpop.permute.xlu1 %3719 }
 0x55d   :  { %v3717_v15 = vunpack.i.h.bf16 %v3715_v13  ;;  %v3716_v16 = vunpack.i.l.bf16 %v3715_v13  ;;  %v3722_v27 = vunpack.i.h.bf16 %v3720_v14  ;;  %v3721_v21 = vunpack.i.l.bf16 %v3720_v14 }
 0x55f   :  { %v1248_v17 = vpack.c.bf16 %v3717_v15, %v3717_v15  ;;  %v1247_v19 = vpack.c.bf16 %v3716_v16, %v3716_v16  ;;  %v4312_v24 = vpack.c.bf16 %v3722_v27, %v3722_v27  ;;  %v4314_v10 = vpack.c.bf16 %v3721_v21, %v3721_v21 }
 0x560   :  { %v3725_v30 = vpop.permute.xlu0 %3724 }
 0x561   :  { %1352 = vrot.lane.b32.xlu0 %v1247_v19, %s3917_s23  ;;  %1401 = vrot.lane.b32.xlu1 %v1248_v17, %s3917_s23  ;;  %v3727_v23 = vunpack.i.h.bf16 %v3725_v30  ;;  %v3726_v25 = vunpack.i.l.bf16 %v3725_v30 }
 0x563   :  { %v4320_v26 = vpack.c.bf16 %v3727_v23, %v3727_v23  ;;  %v4322_v28 = vpack.c.bf16 %v3726_v25, %v3726_v25 }
 0x565   :  { %1450 = vrot.lane.b32.xlu0 %v4314_v10, %s3917_s23  ;;  %1499 = vrot.lane.b32.xlu1 %v4312_v24, %s3917_s23 }
 0x569   :  { %1548 = vrot.lane.b32.xlu0 %v4322_v28, %s3917_s23  ;;  %1597 = vrot.lane.b32.xlu1 %v4320_v26, %s3917_s23 }
 0x584   :  { %v3730_v29 = vpop.permute.xlu1 %3729 }
 0x585   :  { %v3732_v34 = vunpack.i.h.bf16 %v3730_v29  ;;  %v3731_v37 = vunpack.i.l.bf16 %v3730_v29 }
 0x587   :  { %v1112_v41 = vsel %vm200_vm2, %v4281_v22, %v3732_v34  ;;  %v1111_v42 = vsel %vm200_vm2, %v4289_v48, %v3731_v37 }
 0x58c   :  { %v3735_v32 = vpop.permute.xlu0 %3734 }
 0x58d   :  { %v3737_v38 = vunpack.i.h.bf16 %v3735_v32  ;;  %v3736_v39 = vunpack.i.l.bf16 %v3735_v32 }
 0x58f   :  { %v1115_v44 = vsel %vm1113_vm4, %v1112_v41, %v3737_v38  ;;  %v1114_v35 = vsel %vm1113_vm4, %v1111_v42, %v3736_v39 }
 0x590   :  { %v1255_v45 = vpop.permute.xlu0 %1254 }
 0x591   :  { %v1260_v22 = vsel %vm200_vm2, %v1255_v45, 0 }
 0x594   :  { %v3740_v40 = vpop.permute.xlu1 %3739 }
 0x595   :  { %v3742_v33 = vunpack.i.h.bf16 %v3740_v40  ;;  %v3741_v43 = vunpack.i.l.bf16 %v3740_v40 }
 0x597   :  { %v1117_v36 = vsel %vm1116_vm5, %v1114_v35, %v3741_v43  ;;  %v1118_v46 = vsel %vm1116_vm5, %v1115_v44, %v3742_v33 }
 0x598   :  { %v1119_v31 = vpack.c.bf16 %v1118_v46, %v1117_v36  ;;  %v1304_v47 = vpop.permute.xlu1 %1303 }
 0x599   :  { %v1309_v49 = vsel %vm200_vm2, %v1304_v47, 0 }
 0x59a   :  { %3478 = vmatmul.mubr.msk.bf16.vlgmr.msra.gmra.mrb[32].mxu1 %vm124_vm1, %v1119_v31  ;;  %3496 = vmatpush3.bf16.xpose.msra.mxu0 %v1309_v49 }
 0x59b   :  { %3490 = vmatpush3.bf16.xpose.msra.mxu1 %v1260_v22  ;;  %3491 = vmatprep.mubr.msk.bf16.mxu1 %vm3913_vm0, %v3912_v3 }
 0x59c   :  { %3501 = vmatprep.subr.bf16.mxu1 %v3912_v3  ;;  %3507 = vmatprep.subr.bf16.mxu0 %v3912_v3 }
 0x5a1   :  { %3498 = vmatmul.mubr.msk.bf16.vlgmr.msra.gmra.mrb[40].mxu0 %vm200_vm2, %v1246_v12 }
 0x5a2   :  { %3492 = vmatmul.mubr.msk.bf16.vlgmr.msra.gmra.mrb[36].mxu1 %vm200_vm2, %v1245_v9  ;;  %3509 = vmatprep.mubr.msk.bf16.mxu0 %vm3913_vm0, %v3912_v3 }
 0x5a3   :  { %3503 = vmatprep.mubr.msk.bf16.mxu1 %vm3913_vm0, %v3912_v3 }
 0x5d3   :  { %v1353_v48 = vpop.permute.xlu0 %1352  ;;  %v1402_v51 = vpop.permute.xlu1 %1401 }
 0x5d4   :  { %v1358_v53 = vsel %vm200_vm2, %v1353_v48, 0  ;;  %v1407_v54 = vsel %vm200_vm2, %v1402_v51, 0 }
 0x5d5   :  { %3502 = vmatpush3.bf16.xpose.msra.mxu1 %v1358_v53  ;;  %3508 = vmatpush3.bf16.xpose.msra.mxu0 %v1407_v54 }
 0x5d6   :  { %3513 = vmatprep.subr.bf16.mxu1 %v3912_v3  ;;  %3519 = vmatprep.subr.bf16.mxu0 %v3912_v3 }
 0x5d7   :  { %v1451_v55 = vpop.permute.xlu0 %1450  ;;  %v1500_v56 = vpop.permute.xlu1 %1499 }
 0x5d8   :  { %v1456_v57 = vsel %vm200_vm2, %v1451_v55, 0  ;;  %v1505_v59 = vsel %vm200_vm2, %v1500_v56, 0 }
 0x5db   :  { %v1549_v60 = vpop.permute.xlu0 %1548  ;;  %v1598_v61 = vpop.permute.xlu1 %1597 }
 0x5dc   :  { %3504 = vmatmul.mubr.msk.bf16.vlgmr.msra.gmra.mrb[40].mxu1 %vm200_vm2, %v1247_v19  ;;  %3510 = vmatmul.mubr.msk.bf16.vlgmr.msra.gmra.mrb[44].mxu0 %vm200_vm2, %v1248_v17  ;;  %v1554_v20 = vsel %vm200_vm2, %v1549_v60, 0  ;;  %v1603_v52 = vsel %vm200_vm2, %v1598_v61, 0 }
 0x5dd   :  { %3514 = vmatpush3.bf16.xpose.msra.mxu1 %v1456_v57  ;;  %3520 = vmatpush3.bf16.xpose.msra.mxu0 %v1505_v59 }
 0x5de   :  { %3515 = vmatprep.mubr.msk.bf16.mxu1 %vm3913_vm0, %v3912_v3  ;;  %3521 = vmatprep.mubr.msk.bf16.mxu0 %vm3913_vm0, %v3912_v3 }
 0x5df   :  { %3525 = vmatprep.subr.bf16.mxu1 %v3912_v3  ;;  %3531 = vmatprep.subr.bf16.mxu0 %v3912_v3 }
 0x5e4   :  { %3516 = vmatmul.mubr.msk.bf16.vlgmr.msra.gmra.mrb[44].mxu1 %vm200_vm2, %v4314_v10  ;;  %3522 = vmatmul.mubr.msk.bf16.vlgmr.msra.gmra.mrb[48].mxu0 %vm200_vm2, %v4312_v24 }
 0x5e5   :  { %3526 = vmatpush3.bf16.xpose.msra.mxu1 %v1554_v20  ;;  %3532 = vmatpush3.bf16.xpose.msra.mxu0 %v1603_v52 }
 0x5e6   :  { %3527 = vmatprep.mubr.msk.bf16.mxu1 %vm3913_vm0, %v3912_v3  ;;  %3533 = vmatprep.mubr.msk.bf16.mxu0 %vm3913_vm0, %v3912_v3 }
 0x5e7   :  { %3537 = vmatprep.subr.bf16.mxu1 %v3912_v3  ;;  %3543 = vmatprep.subr.bf16.mxu0 %v3912_v3 }
 0x5ec   :  { %3528 = vmatmul.mubr.msk.bf16.vlgmr.msra.gmra.mrb[48].mxu1 %vm200_vm2, %v4322_v28  ;;  %3534 = vmatmul.mubr.msk.bf16.vlgmr.msra.gmra.mrb[52].mxu0 %vm200_vm2, %v4320_v26 }
 0x5ed   :  { %3538 = vmatpush3.bf16.msra.mxu1 %v1757_v50  ;;  %3544 = vmatpush3.bf16.msra.mxu0 %v1803_v18 }
 0x5ee   :  { %3539 = vmatprep.mubr.msk.bf16.mxu1 %vm3913_vm0, %v3912_v3  ;;  %3545 = vmatprep.mubr.msk.bf16.mxu0 %vm3913_vm0, %v3912_v3 }
 0x5ef   :  { %3549 = vmatprep.subr.bf16.mxu1 %v3912_v3  ;;  %3555 = vmatprep.subr.bf16.mxu0 %v3912_v3 }
 0x66d   :  { %v4389_v2 = vpop.f32.mrb[32].mxu1 }
 0x66e   :  { %v3479_v6 = vpop.f32.mrb[33].mxu1 }
 0x66f   :  { %v4391_v7 = vpop.f32.mrb[34].mxu1 }
 0x670   :  { %v3480_v9 = vpop.f32.mrb[35].mxu1 }
 0x674   :  { %v1345_v0 = vpop.f32.mrb[40].mxu0 }
 0x675   :  { %v1646_v4 = vmul.f32 0.35355338, %v1345_v0  ;;  %v1296_v5 = vpop.f32.mrb[36].mxu1  ;;  %v3499_v8 = vpop.f32.mrb[41].mxu0 }
 0x676   :  { %v1645_v11 = vmul.f32 0.35355338, %v1296_v5  ;;  %v3493_v12 = vpop.f32.mrb[37].mxu1  ;;  %v1348_v13 = vpop.f32.mrb[42].mxu0 }
 0x677   :  { %v1299_v14 = vpop.f32.mrb[38].mxu1  ;;  %v3500_v15 = vpop.f32.mrb[43].mxu0  ;;  %v1656_v16 = vsel %vm200_vm2, %v1646_v4, -inf }
 0x678   :  { %v3494_v17 = vpop.f32.mrb[39].mxu1  ;;  %1657 = vmax.xlane.f32.xlu1 %v1656_v16  ;;  %v1653_v19 = vsel %vm200_vm2, %v1645_v11, -inf }
 0x679   :  { %1654 = vmax.xlane.f32.xlu0 %v1653_v19 }
 0x6af   :  { %v1394_v27 = vpop.f32.mrb[40].mxu1  ;;  %v1443_v21 = vpop.f32.mrb[44].mxu0 }
 0x6b0   :  { %v1647_v30 = vmul.f32 0.35355338, %v1394_v27  ;;  %v3505_v24 = vpop.f32.mrb[41].mxu1  ;;  %v3511_v10 = vpop.f32.mrb[45].mxu0  ;;  %v1648_v26 = vmul.f32 0.35355338, %v1443_v21 }
 0x6b1   :  { %v1397_v23 = vpop.f32.mrb[42].mxu1  ;;  %v1446_v25 = vpop.f32.mrb[46].mxu0 }
 0x6b2   :  { %v3506_v28 = vpop.f32.mrb[43].mxu1  ;;  %v3512_v29 = vpop.f32.mrb[47].mxu0  ;;  %v1659_v32 = vsel %vm200_vm2, %v1647_v30, -inf  ;;  %v1662_v34 = vsel %vm200_vm2, %v1648_v26, -inf }
 0x6b3   :  { %1660 = vmax.xlane.f32.xlu0 %v1659_v32 }
 0x6b7   :  { %v1492_v37 = vpop.f32.mrb[44].mxu1  ;;  %1663 = vmax.xlane.f32.xlu0 %v1662_v34  ;;  %v1541_v38 = vpop.f32.mrb[48].mxu0 }
 0x6b8   :  { %v1649_v39 = vmul.f32 0.35355338, %v1492_v37  ;;  %v1650_v40 = vmul.f32 0.35355338, %v1541_v38  ;;  %v3517_v41 = vpop.f32.mrb[45].mxu1  ;;  %v3523_v42 = vpop.f32.mrb[49].mxu0 }
 0x6b9   :  { %v1495_v33 = vpop.f32.mrb[46].mxu1  ;;  %v1544_v43 = vpop.f32.mrb[50].mxu0 }
 0x6ba   :  { %v3518_v44 = vpop.f32.mrb[47].mxu1  ;;  %v3524_v35 = vpop.f32.mrb[51].mxu0  ;;  %v1665_v45 = vsel %vm200_vm2, %v1649_v39, -inf  ;;  %v1668_v36 = vsel %vm200_vm2, %v1650_v40, -inf }
 0x6bb   :  { %1666 = vmax.xlane.f32.xlu1 %v1665_v45  ;;  %1669 = vmax.xlane.f32.xlu0 %v1668_v36 }
 0x6bf   :  { %v1590_v46 = vpop.f32.mrb[48].mxu1  ;;  %v1639_v31 = vpop.f32.mrb[52].mxu0 }
 0x6c0   :  { %v1651_v47 = vmul.f32 0.35355338, %v1590_v46  ;;  %v1652_v49 = vmul.f32 0.35355338, %v1639_v31  ;;  %v3529_v22 = vpop.f32.mrb[49].mxu1  ;;  %v3535_v48 = vpop.f32.mrb[53].mxu0 }
 0x6c1   :  { %v1593_v51 = vpop.f32.mrb[50].mxu1  ;;  %v1642_v53 = vpop.f32.mrb[54].mxu0 }
 0x6c2   :  { %v3530_v54 = vpop.f32.mrb[51].mxu1  ;;  %v3536_v55 = vpop.f32.mrb[55].mxu0  ;;  %v1671_v56 = vsel %vm200_vm2, %v1651_v47, -inf  ;;  %v1674_v57 = vsel %vm200_vm2, %v1652_v49, -inf }
 0x6c3   :  { %1672 = vmax.xlane.f32.xlu1 %v1671_v56  ;;  %1675 = vmax.xlane.f32.xlu0 %v1674_v57  ;;  %v3213_v55 = vld [vmem:[%s4761_s8] ss:$0 sm:$0xff] }
 0x705   :  { %v1658_v59 = vpop.xlane.xlu1 %1657 }
 0x706   :  { %v1678_v60 = vsub.f32 %v1646_v4, %v1658_v59  ;;  %v1655_v61 = vpop.xlane.xlu0 %1654 }
 0x707   :  { %v1677_v20 = vsub.f32 %v1645_v11, %v1655_v61 }
 0x708   :  { %v1687_v52 = vmul.f32 1.442695, %v1678_v60 }
 0x709   :  { %v1685_v62 = vmul.f32 1.442695, %v1677_v20 }
 0x70a   :  { %3820 = vpow2.f32 %v1687_v52  ;;  %v1166_v52 = vadd.f32 %v3213_v55, %v4389_v2 }
 0x70b   :  { %3822 = vpow2.f32 %v1685_v62 }
 0x714   :  { %v4401_v63 = vpop.eup %3820 }
 0x715   :  { %v4403_v1 = vpop.eup %3822  ;;  %v1704_v58 = vsel %vm200_vm2, %v4401_v63, 0.0 }
 0x716   :  { %1705 = vadd.xlane.f32.xlu0 %v1704_v58  ;;  %v1701_v50 = vsel %vm200_vm2, %v4403_v1, 0.0 }
 0x717   :  { %1702 = vadd.xlane.f32.xlu1 %v1701_v50  ;;  %v1169_v50 = vadd.f32 %v3213_v55, %v4391_v7  ;;  %v84_v7 = vld [vmem:[%s4762_s9] sm:$0xff] }
 0x740   :  { %v1661_v18 = vpop.xlane.xlu0 %1660 }
 0x741   :  { %v1679_v6 = vsub.f32 %v1647_v30, %v1661_v18 }
 0x743   :  { %v1689_v9 = vmul.f32 1.442695, %v1679_v6 }
 0x744   :  { %v1664_v0 = vpop.xlane.xlu0 %1663 }
 0x745   :  { %3824 = vpow2.f32 %v1689_v9  ;;  %v1680_v4 = vsub.f32 %v1648_v26, %v1664_v0  ;;  %v1847_v0 = vpack.c.bf16 %v1166_v52, %v1166_v52 }
 0x747   :  { %v1691_v5 = vmul.f32 1.442695, %v1680_v4 }
 0x748   :  { %v1667_v8 = vpop.xlane.xlu1 %1666  ;;  %v1670_v11 = vpop.xlane.xlu0 %1669 }
 0x749   :  { %3826 = vpow2.f32 %v1691_v5  ;;  %v1681_v12 = vsub.f32 %v1649_v39, %v1667_v8  ;;  %v1682_v13 = vsub.f32 %v1650_v40, %v1670_v11  ;;  %v1848_v5 = vpack.c.bf16 %v1169_v50, %v1169_v50 }
 0x74b   :  { %v1693_v14 = vmul.f32 1.442695, %v1681_v12  ;;  %v1695_v15 = vmul.f32 1.442695, %v1682_v13  ;;  %v1853_v12 = vsel %vm707_vm3, %v1847_v0, 0  ;;  %v1899_v2 = vsel %vm707_vm3, %v1848_v5, 0 }
 0x74c   :  { %v85_v13 = vld [vmem:[%s4762_s9 + $0x8] sm:$0xff] }
 0x74d   :  { %3828 = vpow2.f32 %v1693_v14  ;;  %v89_v14 = vld [vmem:[%s4764_s11] sm:$0xff] }
 0x74e   :  { %3830 = vpow2.f32 %v1695_v15  ;;  %v90_v15 = vld [vmem:[%s4764_s11 + $0x8] sm:$0xff] }
 0x74f   :  { %v3825_v16 = vpop.eup %3824 }
 0x750   :  { %v1673_v17 = vpop.xlane.xlu1 %1672  ;;  %v1676_v19 = vpop.xlane.xlu0 %1675  ;;  %v1707_v27 = vsel %vm200_vm2, %v3825_v16, 0.0 }
 0x751   :  { %v1683_v21 = vsub.f32 %v1651_v47, %v1673_v17  ;;  %v1684_v30 = vsub.f32 %v1652_v49, %v1676_v19  ;;  %1708 = vadd.xlane.f32.xlu1 %v1707_v27  ;;  %v1942_v17 = vpack.c.bf16 %v85_v13, %v84_v7 }
 0x753   :  { %v3827_v24 = vpop.eup %3826  ;;  %v1697_v10 = vmul.f32 1.442695, %v1683_v21  ;;  %v1699_v23 = vmul.f32 1.442695, %v1684_v30  ;;  %v1995_v30 = vpack.c.bf16 %v90_v15, %v89_v14 }
 0x754   :  { %v1710_v25 = vsel %vm200_vm2, %v3827_v24, 0.0 }
 0x755   :  { %3832 = vpow2.f32 %v1697_v10  ;;  %1711 = vadd.xlane.f32.xlu0 %v1710_v25  ;;  %v91_v25 = vld [vmem:[%s4764_s11 + $0x10] sm:$0xff] }
 0x756   :  { %3834 = vpow2.f32 %v1699_v23 }
 0x757   :  { %v3829_v26 = vpop.eup %3828 }
 0x758   :  { %v3831_v28 = vpop.eup %3830  ;;  %v1713_v29 = vsel %vm200_vm2, %v3829_v26, 0.0 }
 0x759   :  { %1714 = vadd.xlane.f32.xlu1 %v1713_v29  ;;  %v1716_v32 = vsel %vm200_vm2, %v3831_v28, 0.0 }
 0x75a   :  { %1717 = vadd.xlane.f32.xlu0 %v1716_v32 }
 0x75f   :  { %v3833_v34 = vpop.eup %3832 }
 0x760   :  { %v3835_v37 = vpop.eup %3834  ;;  %v1719_v38 = vsel %vm200_vm2, %v3833_v34, 0.0 }
 0x761   :  { %1720 = vadd.xlane.f32.xlu1 %v1719_v38  ;;  %v1722_v39 = vsel %vm200_vm2, %v3835_v37, 0.0  ;;  %v67_v38 = vld [vmem:[%s4783_s5 + $0x8] sm:$0xff] }
 0x762   :  { %1723 = vadd.xlane.f32.xlu0 %v1722_v39 }
 0x7a3   :  { %v1706_v40 = vpop.xlane.xlu0 %1705 }
 0x7a4   :  { %v1703_v41 = vpop.xlane.xlu1 %1702  ;;  %3836 = vrcp.f32 %v1706_v40  ;;  %v86_v40 = vld [vmem:[%s4762_s9 + $0x10] sm:$0xff] }
 0x7a5   :  { %3838 = vrcp.f32 %v1703_v41  ;;  %v87_v41 = vld [vmem:[%s4762_s9 + $0x18] sm:$0xff] }
 0x7ae   :  { %v3837_v45 = vpop.eup %3836 }
 0x7af   :  { %v3839_v46 = vpop.eup %3838  ;;  %v1734_v56 = vmul.f32 %v3837_v45, %v4401_v63 }
 0x7b0   :  { %v1733_v53 = vmul.f32 %v3839_v46, %v4403_v1 }
 0x7de   :  { %v1709_v42 = vpop.xlane.xlu1 %1708 }
 0x7df   :  { %3840 = vrcp.f32 %v1709_v42  ;;  %v1943_v42 = vpack.c.bf16 %v87_v41, %v86_v40 }
 0x7e2   :  { %v1712_v33 = vpop.xlane.xlu0 %1711 }
 0x7e3   :  { %3842 = vrcp.f32 %v1712_v33 }
 0x7e6   :  { %v1715_v43 = vpop.xlane.xlu1 %1714 }
 0x7e7   :  { %v1718_v44 = vpop.xlane.xlu0 %1717  ;;  %3844 = vrcp.f32 %v1715_v43 }
 0x7e8   :  { %3846 = vrcp.f32 %v1718_v44 }
 0x7e9   :  { %v3841_v31 = vpop.eup %3840 }
 0x7ea   :  { %v1735_v48 = vmul.f32 %v3841_v31, %v3825_v16 }
 0x7ec   :  { %v1741_v59 = vadd.f32 %v1735_v48, %v1733_v53 }
 0x7ed   :  { %v3843_v47 = vpop.eup %3842 }
 0x7ee   :  { %v1721_v35 = vpop.xlane.xlu1 %1720  ;;  %v1736_v51 = vmul.f32 %v3843_v47, %v3827_v24 }
 0x7ef   :  { %3848 = vrcp.f32 %v1721_v35  ;;  %v1724_v36 = vpop.xlane.xlu0 %1723 }
 0x7f0   :  { %3850 = vrcp.f32 %v1724_v36  ;;  %v1742_v61 = vadd.f32 %v1736_v51, %v1734_v56 }
 0x7f1   :  { %v3845_v49 = vpop.eup %3844 }
 0x7f2   :  { %v3847_v22 = vpop.eup %3846  ;;  %v1737_v54 = vmul.f32 %v3845_v49, %v3829_v26  ;;  %v92_v26 = vld [vmem:[%s4764_s11 + $0x18] sm:$0xff]  ;;  %v3231_v49 = vld [vmem:[%s4765_s12] ss:$0 sm:$0xff] }
 0x7f3   :  { %v1738_v57 = vmul.f32 %v3847_v22, %v3831_v28 }
 0x7f4   :  { %v1743_v62 = vadd.f32 %v1741_v59, %v1737_v54 }
 0x7f5   :  { %v1744_v18 = vadd.f32 %v1742_v61, %v1738_v57 }
 0x7f9   :  { %v3849_v60 = vpop.eup %3848 }
 0x7fa   :  { %v3851_v20 = vpop.eup %3850  ;;  %v1739_v58 = vmul.f32 %v3849_v60, %v3833_v34  ;;  %v1996_v34 = vpack.c.bf16 %v92_v26, %v91_v25 }
 0x7fb   :  { %v1740_v1 = vmul.f32 %v3851_v20, %v3835_v37  ;;  %v66_v37 = vld [vmem:[%s4783_s5] sm:$0xff] }
 0x7fc   :  { %v1745_v6 = vadd.f32 %v1743_v62, %v1739_v58  ;;  %v1994_v39 = vpack.c.bf16 %v67_v38, %v66_v37  ;;  %v3229_v62 = vld [vmem:[%s4763_s10] ss:$0 sm:$0xff] }
 0x7fd   :  { %v1746_v9 = vadd.f32 %v1744_v18, %v1740_v1 }
 0x7fe   :  { %v1747_v4 = vmul.f32 0.25, %v1745_v6 }
 0x7ff   :  { %v1748_v8 = vmul.f32 0.25, %v1746_v9 }
 0x800   :  { %v1749_v63 = vpack.c.bf16 %v1747_v4, %v1747_v4 }
 0x801   :  { %v1750_v11 = vpack.c.bf16 %v1748_v8, %v1748_v8 }
 0x802   :  { %3540 = vmatmul.mubr.msk.bf16.vlgmr.msra.gmra.mrb[52].mxu1 %vm200_vm2, %v1749_v63 }
 0x803   :  { %3546 = vmatmul.mubr.msk.bf16.vlgmr.msra.gmra.mrb[56].mxu0 %vm200_vm2, %v1750_v11  ;;  %3550 = vmatpush3.bf16.msra.mxu1 %v1853_v12 }
 0x804   :  { %3556 = vmatpush3.bf16.msra.mxu0 %v1899_v2  ;;  %3551 = vmatprep.mubr.msk.bf16.mxu1 %vm3913_vm0, %v3912_v3 }
 0x805   :  { %3557 = vmatprep.mubr.msk.bf16.mxu0 %vm3913_vm0, %v3912_v3  ;;  %3569 = vmatprep.subr.bf16.mxu0 %v3912_v3 }
 0x806   :  { %3561 = vmatprep.subr.bf16.mxu1 %v3912_v3 }
 0x8d5   :  { %v1793_v16 = vpop.f32.mrb[52].mxu1 }
 0x8d6   :  { %v1845_v19 = vpack.c.bf16 %v1793_v16, %v1793_v16  ;;  %v1839_v27 = vpop.f32.mrb[56].mxu0  ;;  %v3541_v21 = vpop.f32.mrb[53].mxu1 }
 0x8d7   :  { %v1846_v24 = vpack.c.bf16 %v1839_v27, %v1839_v27  ;;  %v3547_v10 = vpop.f32.mrb[57].mxu0  ;;  %v1796_v23 = vpop.f32.mrb[54].mxu1 }
 0x8d8   :  { %v1842_v28 = vpop.f32.mrb[58].mxu0  ;;  %v3542_v29 = vpop.f32.mrb[55].mxu1  ;;  %3552 = vmatmul.mubr.msk.bf16.vlgmr.msra.gmra.mrb[56].mxu1 %vm200_vm2, %v1845_v19 }
 0x8d9   :  { %v3548_v32 = vpop.f32.mrb[59].mxu0  ;;  %3558 = vmatmul.mubr.msk.bf16.vlgmr.msra.gmra.mrb[60].mxu0 %vm200_vm2, %v1846_v24  ;;  %3562 = vmatpush3.bf16.msra.mxu1 %v1942_v17 }
 0x8da   :  { %3570 = vmatpush3.bf16.msra.mxu0 %v1995_v30  ;;  %3573 = vmatprep.mubr.msk.bf16.mxu0 %vm3913_vm0, %v3912_v3 }
 0x8db   :  { %3571 = vmatprep.subr.bf16.mxu0 %v3912_v3  ;;  %3563 = vmatprep.subr.bf16.mxu1 %v3912_v3 }
 0x8dc   :  { %3565 = vmatprep.mubr.msk.bf16.mxu1 %vm3913_vm0, %v3912_v3 }
 0x8dd   :  { %3564 = vmatpush3.bf16.msra.mxu1 %v1943_v42 }
 0x8de   :  { %3572 = vmatpush3.bf16.msra.mxu0 %v1996_v34  ;;  %3577 = vmatprep.subr.bf16.mxu1 %v3912_v3 }
 0x8df   :  { %3583 = vmatprep.subr.bf16.mxu0 %v3912_v3 }
 0x8e1   :  { %3574 = vmatmul.mubr.msk.bf16.vlgmr.msra.gmra.mrb[64].mxu0 %vm124_vm1, %v1994_v39 }
 0x8e2   :  { %3585 = vmatprep.mubr.msk.bf16.mxu0 %vm3913_vm0, %v3912_v3 }
 0x9ab   :  { %v1889_v33 = vpop.f32.mrb[56].mxu1 }
 0x9ac   :  { %v1935_v43 = vpop.f32.mrb[60].mxu0  ;;  %v3553_v44 = vpop.f32.mrb[57].mxu1 }
 0x9ad   :  { %v1941_v35 = vpack.c.bf16 %v1935_v43, %v1889_v33  ;;  %v3559_v45 = vpop.f32.mrb[61].mxu0  ;;  %v1892_v36 = vpop.f32.mrb[58].mxu1 }
 0x9ae   :  { %v1938_v46 = vpop.f32.mrb[62].mxu0  ;;  %v3554_v31 = vpop.f32.mrb[59].mxu1 }
 0x9af   :  { %v3560_v47 = vpop.f32.mrb[63].mxu0  ;;  %3566 = vmatmul.mubr.msk.bf16.vlgmr.msra.gmra.mrb[60].mxu1 %vm124_vm1, %v1941_v35 }
 0x9b0   :  { %3579 = vmatprep.mubr.msk.bf16.mxu1 %vm3913_vm0, %v3912_v3 }
 0x9b4   :  { %v2040_v22 = vpop.f32.mrb[64].mxu0 }
 0x9b5   :  { %v2041_v48 = vadd.f32 %v3231_v49, %v2040_v22  ;;  %v3575_v51 = vpop.f32.mrb[65].mxu0 }
 0x9b6   :  { %v2043_v53 = vpop.f32.mrb[66].mxu0 }
 0x9b7   :  { %v2044_v54 = vadd.f32 %v3231_v49, %v2043_v53  ;;  %v3576_v55 = vpop.f32.mrb[67].mxu0  ;;  %v2095_v56 = vpack.c.bf16 %v2041_v48, %v2041_v48 }
 0x9b9   :  { %v3743_v57 = vpack.i.bf16 %v2044_v54, %v2041_v48  ;;  %v2107_v59 = vsel %vm200_vm2, %v2095_v56, 0  ;;  %v4484_v60 = vpack.c.bf16 %v2044_v54, %v2044_v54 }
 0x9ba   :  { %3578 = vmatpush3.bf16.xpose.msra.mxu1 %v2107_v59 }
 0x9bb   :  { %3744 = vrot.lane.b32.xlu1 %v3743_v57, %s3915_s22  ;;  %3589 = vmatprep.subr.bf16.mxu1 %v3912_v3  ;;  %v2153_v61 = vsel %vm200_vm2, %v4484_v60, 0 }
 0x9bc   :  { %3584 = vmatpush3.bf16.xpose.msra.mxu0 %v2153_v61 }
 0x9bd   :  { %3595 = vmatprep.subr.bf16.mxu0 %v3912_v3 }
 0x9bf   :  { %3754 = vrot.lane.b32.xlu1 %v3743_v57, %s3916_s2 }
 0xa2d   :  { %v3745_v20 = vpop.permute.xlu1 %3744 }
 0xa2e   :  { %v3746_v52 = vunpack.i.l.bf16 %v3745_v20  ;;  %v3747_v58 = vunpack.i.h.bf16 %v3745_v20 }
 0xa30   :  { %v4493_v50 = vpack.c.bf16 %v3746_v52, %v3746_v52  ;;  %v4495_v0 = vpack.c.bf16 %v3747_v58, %v3747_v58 }
 0xa31   :  { %v3755_v7 = vpop.permute.xlu1 %3754 }
 0xa32   :  { %v2199_v63 = vsel %vm200_vm2, %v4493_v50, 0  ;;  %v2245_v2 = vsel %vm200_vm2, %v4495_v0, 0  ;;  %v3757_v13 = vunpack.i.h.bf16 %v3755_v7  ;;  %v3756_v14 = vunpack.i.l.bf16 %v3755_v7 }
 0xa34   :  { %v4514_v16 = vpack.c.bf16 %v3757_v13, %v3757_v13  ;;  %v4516_v17 = vpack.c.bf16 %v3756_v14, %v3756_v14 }
 0xa36   :  { %v2291_v26 = vsel %vm200_vm2, %v4516_v17, 0  ;;  %v2337_v28 = vsel %vm200_vm2, %v4514_v16, 0 }
 0xa82   :  { %v1987_v18 = vpop.f32.mrb[60].mxu1 }
 0xa83   :  { %v1988_v1 = vadd.f32 %v3229_v62, %v1987_v18  ;;  %v3567_v6 = vpop.f32.mrb[61].mxu1 }
 0xa84   :  { %v1990_v9 = vpop.f32.mrb[62].mxu1 }
 0xa85   :  { %v2087_v4 = vpack.c.bf16 %v1988_v1, %v1988_v1  ;;  %v1991_v5 = vadd.f32 %v3229_v62, %v1990_v9  ;;  %v3568_v8 = vpop.f32.mrb[63].mxu1 }
 0xa87   :  { %v2088_v11 = vpack.c.bf16 %v1991_v5, %v1991_v5  ;;  %3580 = vmatmul.mubr.msk.bf16.vlgmr.msra.gmra.mrb[64].mxu1 %vm200_vm2, %v2087_v4  ;;  %v3748_v12 = vpack.i.bf16 %v1991_v5, %v1988_v1 }
 0xa88   :  { %3590 = vmatpush3.bf16.xpose.msra.mxu1 %v2199_v63  ;;  %3591 = vmatprep.mubr.msk.bf16.mxu1 %vm3913_vm0, %v3912_v3 }
 0xa89   :  { %3749 = vrot.lane.b32.xlu0 %v3748_v12, %s3915_s22  ;;  %3759 = vrot.lane.b32.xlu1 %v3748_v12, %s3916_s2 }
 0xa8a   :  { %3586 = vmatmul.mubr.msk.bf16.vlgmr.msra.gmra.mrb[68].mxu0 %vm200_vm2, %v2088_v11  ;;  %3601 = vmatprep.subr.bf16.mxu1 %v3912_v3 }
 0xa8b   :  { %3596 = vmatpush3.bf16.xpose.msra.mxu0 %v2245_v2  ;;  %3597 = vmatprep.mubr.msk.bf16.mxu0 %vm3913_vm0, %v3912_v3 }
 0xa8c   :  { %3607 = vmatprep.subr.bf16.mxu0 %v3912_v3 }
 0xa8d   :  { %3764 = vrot.lane.b32.xlu0 %v3743_v57, %s3914_s1  ;;  %3769 = vrot.lane.b32.xlu1 %v3748_v12, %s3914_s1 }
 0xa91   :  { %2576 = vrot.lane.b32.xlu1 %v2095_v56, %s3917_s23 }
 0xafb   :  { %v3750_v15 = vpop.permute.xlu0 %3749  ;;  %v3760_v24 = vpop.permute.xlu1 %3759 }
 0xafc   :  { %v3752_v19 = vunpack.i.h.bf16 %v3750_v15  ;;  %v3751_v27 = vunpack.i.l.bf16 %v3750_v15  ;;  %v3762_v29 = vunpack.i.h.bf16 %v3760_v24  ;;  %v3761_v32 = vunpack.i.l.bf16 %v3760_v24 }
 0xafe   :  { %v2090_v21 = vpack.c.bf16 %v3752_v19, %v3752_v19  ;;  %v2089_v30 = vpack.c.bf16 %v3751_v27, %v3751_v27  ;;  %v2092_v38 = vpack.c.bf16 %v3762_v29, %v3762_v29  ;;  %v2091_v39 = vpack.c.bf16 %v3761_v32, %v3761_v32 }
 0xaff   :  { %v3765_v10 = vpop.permute.xlu0 %3764  ;;  %v3770_v40 = vpop.permute.xlu1 %3769 }
 0xb00   :  { %v3767_v23 = vunpack.i.h.bf16 %v3765_v10  ;;  %v3766_v25 = vunpack.i.l.bf16 %v3765_v10  ;;  %3592 = vmatmul.mubr.msk.bf16.vlgmr.msra.gmra.mrb[68].mxu1 %vm200_vm2, %v2089_v30  ;;  %3598 = vmatmul.mubr.msk.bf16.vlgmr.msra.gmra.mrb[72].mxu0 %vm200_vm2, %v2090_v21  ;;  %v3772_v33 = vunpack.i.h.bf16 %v3770_v40  ;;  %v3771_v43 = vunpack.i.l.bf16 %v3770_v40 }
 0xb01   :  { %3602 = vmatpush3.bf16.xpose.msra.mxu1 %v2291_v26  ;;  %3608 = vmatpush3.bf16.xpose.msra.mxu0 %v2337_v28 }
 0xb02   :  { %3603 = vmatprep.mubr.msk.bf16.mxu1 %vm3913_vm0, %v3912_v3  ;;  %3609 = vmatprep.mubr.msk.bf16.mxu0 %vm3913_vm0, %v3912_v3  ;;  %v4529_v34 = vpack.c.bf16 %v3767_v23, %v3767_v23  ;;  %v4531_v37 = vpack.c.bf16 %v3766_v25, %v3766_v25  ;;  %v2094_v35 = vpack.c.bf16 %v3772_v33, %v3772_v33 }
 0xb03   :  { %3613 = vmatprep.subr.bf16.mxu1 %v3912_v3  ;;  %3619 = vmatprep.subr.bf16.mxu0 %v3912_v3  ;;  %v2577_v44 = vpop.permute.xlu1 %2576  ;;  %v2093_v45 = vpack.c.bf16 %v3771_v43, %v3771_v43 }
 0xb04   :  { %v2383_v41 = vsel %vm200_vm2, %v4531_v37, 0  ;;  %v2429_v42 = vsel %vm200_vm2, %v4529_v34, 0  ;;  %v2582_v36 = vsel %vm707_vm3, %v2577_v44, 0 }
 0xb08   :  { %3604 = vmatmul.mubr.msk.bf16.vlgmr.msra.gmra.mrb[72].mxu1 %vm200_vm2, %v2091_v39  ;;  %3610 = vmatmul.mubr.msk.bf16.vlgmr.msra.gmra.mrb[76].mxu0 %vm200_vm2, %v2092_v38 }
 0xb09   :  { %3614 = vmatpush3.bf16.xpose.msra.mxu1 %v2383_v41  ;;  %3620 = vmatpush3.bf16.xpose.msra.mxu0 %v2429_v42 }
 0xb0a   :  { %3615 = vmatprep.mubr.msk.bf16.mxu1 %vm3913_vm0, %v3912_v3  ;;  %3621 = vmatprep.mubr.msk.bf16.mxu0 %vm3913_vm0, %v3912_v3 }
 0xb0b   :  { %3625 = vmatprep.subr.bf16.mxu1 %v3912_v3  ;;  %3631 = vmatprep.subr.bf16.mxu0 %v3912_v3 }
 0xb10   :  { %3616 = vmatmul.mubr.msk.bf16.vlgmr.msra.gmra.mrb[76].mxu1 %vm200_vm2, %v2093_v45  ;;  %3622 = vmatmul.mubr.msk.bf16.vlgmr.msra.gmra.mrb[80].mxu0 %vm200_vm2, %v2094_v35 }
 0xb11   :  { %3626 = vmatpush3.bf16.msra.mxu1 %v2582_v36  ;;  %3633 = vmatprep.mubr.msk.bf16.mxu0 %vm3913_vm0, %v3912_v3 }
 0xb12   :  { %3627 = vmatprep.mubr.msk.bf16.mxu1 %vm3913_vm0, %v3912_v3  ;;  %3637 = vmatprep.subr.bf16.mxu1 %v3912_v3 }
 0xb5a   :  { %v2143_v46 = vpop.f32.mrb[64].mxu1 }
 0xb5b   :  { %v4554_v31 = vmul.f32 0.35355338, %v2143_v46  ;;  %v3581_v47 = vpop.f32.mrb[65].mxu1 }
 0xb5c   :  { %v2146_v49 = vpop.f32.mrb[66].mxu1 }
 0xb5d   :  { %v2189_v22 = vpop.f32.mrb[68].mxu0  ;;  %v3582_v48 = vpop.f32.mrb[67].mxu1  ;;  %v2479_v51 = vsel %vm200_vm2, %v4554_v31, -inf }
 0xb5e   :  { %v2472_v53 = vmul.f32 0.35355338, %v2189_v22  ;;  %v3587_v54 = vpop.f32.mrb[69].mxu0  ;;  %2480 = vmax.xlane.f32.xlu0 %v2479_v51 }
 0xb5f   :  { %v2192_v55 = vpop.f32.mrb[70].mxu0 }
 0xb60   :  { %v3588_v56 = vpop.f32.mrb[71].mxu0  ;;  %v2482_v57 = vsel %vm200_vm2, %v2472_v53, -inf }
 0xb61   :  { %2483 = vmax.xlane.f32.xlu1 %v2482_v57 }
 0xbd3   :  { %v2235_v59 = vpop.f32.mrb[68].mxu1  ;;  %v2281_v61 = vpop.f32.mrb[72].mxu0 }
 0xbd4   :  { %v2473_v20 = vmul.f32 0.35355338, %v2235_v59  ;;  %v3593_v52 = vpop.f32.mrb[69].mxu1  ;;  %v3599_v62 = vpop.f32.mrb[73].mxu0  ;;  %v2474_v1 = vmul.f32 0.35355338, %v2281_v61 }
 0xbd5   :  { %v2238_v58 = vpop.f32.mrb[70].mxu1  ;;  %v2284_v18 = vpop.f32.mrb[74].mxu0 }
 0xbd6   :  { %v3594_v6 = vpop.f32.mrb[71].mxu1  ;;  %v3600_v9 = vpop.f32.mrb[75].mxu0  ;;  %v2485_v4 = vsel %vm200_vm2, %v2473_v20, -inf  ;;  %v2488_v5 = vsel %vm200_vm2, %v2474_v1, -inf }
 0xbd7   :  { %2486 = vmax.xlane.f32.xlu0 %v2485_v4 }
 0xbdb   :  { %v2327_v8 = vpop.f32.mrb[72].mxu1  ;;  %2489 = vmax.xlane.f32.xlu0 %v2488_v5  ;;  %v2373_v63 = vpop.f32.mrb[76].mxu0 }
 0xbdc   :  { %v4561_v11 = vmul.f32 0.35355338, %v2327_v8  ;;  %v4563_v12 = vmul.f32 0.35355338, %v2373_v63  ;;  %v3605_v2 = vpop.f32.mrb[73].mxu1  ;;  %v3611_v7 = vpop.f32.mrb[77].mxu0 }
 0xbdd   :  { %v2330_v13 = vpop.f32.mrb[74].mxu1  ;;  %v2376_v14 = vpop.f32.mrb[78].mxu0 }
 0xbde   :  { %v3606_v15 = vpop.f32.mrb[75].mxu1  ;;  %v3612_v19 = vpop.f32.mrb[79].mxu0  ;;  %v2491_v27 = vsel %vm200_vm2, %v4561_v11, -inf  ;;  %v2494_v21 = vsel %vm200_vm2, %v4563_v12, -inf }
 0xbdf   :  { %2492 = vmax.xlane.f32.xlu1 %v2491_v27  ;;  %2495 = vmax.xlane.f32.xlu0 %v2494_v21 }
 0xbe3   :  { %v2419_v30 = vpop.f32.mrb[76].mxu1  ;;  %v2465_v24 = vpop.f32.mrb[80].mxu0 }
 0xbe4   :  { %v2477_v10 = vmul.f32 0.35355338, %v2419_v30  ;;  %v2478_v23 = vmul.f32 0.35355338, %v2465_v24  ;;  %v3617_v25 = vpop.f32.mrb[77].mxu1  ;;  %v3623_v26 = vpop.f32.mrb[81].mxu0 }
 0xbe5   :  { %v2422_v28 = vpop.f32.mrb[78].mxu1  ;;  %v2468_v29 = vpop.f32.mrb[82].mxu0 }
 0xbe6   :  { %v3618_v32 = vpop.f32.mrb[79].mxu1  ;;  %v3624_v38 = vpop.f32.mrb[83].mxu0  ;;  %v2497_v39 = vsel %vm200_vm2, %v2477_v10, -inf  ;;  %v2500_v40 = vsel %vm200_vm2, %v2478_v23, -inf }
 0xbe7   :  { %2498 = vmax.xlane.f32.xlu1 %v2497_v39  ;;  %2501 = vmax.xlane.f32.xlu0 %v2500_v40 }
 0xbeb   :  { %v2481_v33 = vpop.xlane.xlu0 %2480 }
 0xbec   :  { %v2503_v43 = vsub.f32 %v4554_v31, %v2481_v33 }
 0xbee   :  { %v2484_v41 = vpop.xlane.xlu1 %2483  ;;  %v2511_v35 = vmul.f32 1.442695, %v2503_v43 }
 0xbef   :  { %v2504_v42 = vsub.f32 %v2472_v53, %v2484_v41 }
 0xbf1   :  { %v2513_v44 = vmul.f32 1.442695, %v2504_v42 }
 0xbf3   :  { %3852 = vpow2.f32 %v2513_v44 }
 0xbf4   :  { %3854 = vpow2.f32 %v2511_v35 }
 0xbf8   :  { %2674 = vrot.lane.b32.xlu1 %v4493_v50, %s3917_s23 }
 0xbfc   :  { %2723 = vrot.lane.b32.xlu1 %v4495_v0, %s3917_s23 }
 0xbfd   :  { %2625 = vrot.lane.b32.xlu0 %v4484_v60, %s3917_s23  ;;  %v3853_v45 = vpop.eup %3852 }
 0xbfe   :  { %v2530_v36 = vsel %vm200_vm2, %v3853_v45, 0.0  ;;  %v4579_v46 = vpop.eup %3854 }
 0xbff   :  { %v2527_v50 = vsel %vm200_vm2, %v4579_v46, 0.0 }
 0xc1c   :  { %2531 = vadd.xlane.f32.xlu0 %v2530_v36 }
 0xc20   :  { %2528 = vadd.xlane.f32.xlu1 %v2527_v50 }
 0xc64   :  { %v2487_v60 = vpop.xlane.xlu0 %2486 }
 0xc65   :  { %v2505_v0 = vsub.f32 %v2473_v20, %v2487_v60 }
 0xc67   :  { %v2515_v47 = vmul.f32 1.442695, %v2505_v0 }
 0xc68   :  { %v2490_v49 = vpop.xlane.xlu0 %2489 }
 0xc69   :  { %3856 = vpow2.f32 %v2515_v47  ;;  %v2506_v31 = vsub.f32 %v2474_v1, %v2490_v49 }
 0xc6b   :  { %v2517_v22 = vmul.f32 1.442695, %v2506_v31 }
 0xc6c   :  { %v2496_v48 = vpop.xlane.xlu0 %2495  ;;  %v2493_v61 = vpop.xlane.xlu1 %2492 }
 0xc6d   :  { %3858 = vpow2.f32 %v2517_v22  ;;  %v2507_v20 = vsub.f32 %v4561_v11, %v2493_v61  ;;  %v2508_v62 = vsub.f32 %v4563_v12, %v2496_v48 }
 0xc6f   :  { %v2519_v58 = vmul.f32 1.442695, %v2507_v20  ;;  %v2521_v1 = vmul.f32 1.442695, %v2508_v62 }
 0xc71   :  { %3860 = vpow2.f32 %v2519_v58 }
 0xc72   :  { %3862 = vpow2.f32 %v2521_v1 }
 0xc73   :  { %v4583_v51 = vpop.eup %3856 }
 0xc74   :  { %v2502_v53 = vpop.xlane.xlu0 %2501  ;;  %v2533_v54 = vsel %vm200_vm2, %v4583_v51, 0.0  ;;  %v2499_v52 = vpop.xlane.xlu1 %2498 }
 0xc75   :  { %2534 = vadd.xlane.f32.xlu1 %v2533_v54  ;;  %v2509_v18 = vsub.f32 %v2477_v10, %v2499_v52  ;;  %v2510_v9 = vsub.f32 %v2478_v23, %v2502_v53 }
 0xc77   :  { %v4587_v55 = vpop.eup %3858  ;;  %v2523_v6 = vmul.f32 1.442695, %v2509_v18  ;;  %v2525_v4 = vmul.f32 1.442695, %v2510_v9 }
 0xc78   :  { %v2626_v56 = vpop.permute.xlu0 %2625  ;;  %v2536_v57 = vsel %vm200_vm2, %v4587_v55, 0.0  ;;  %v2675_v5 = vpop.permute.xlu1 %2674 }
 0xc79   :  { %v2631_v59 = vsel %vm707_vm3, %v2626_v56, 0  ;;  %2537 = vadd.xlane.f32.xlu0 %v2536_v57  ;;  %3864 = vpow2.f32 %v2523_v6  ;;  %v2680_v25 = vsel %vm707_vm3, %v2675_v5, 0 }
 0xc7a   :  { %3632 = vmatpush3.bf16.msra.mxu0 %v2631_v59  ;;  %3866 = vpow2.f32 %v2525_v4 }
 0xc7b   :  { %3643 = vmatprep.subr.bf16.mxu0 %v3912_v3 }
 0xc7c   :  { %v2724_v8 = vpop.permute.xlu1 %2723 }
 0xc7d   :  { %v2729_v24 = vsel %vm707_vm3, %v2724_v8, 0 }
 0xc86   :  { %2821 = vrot.lane.b32.xlu1 %v4514_v16, %s3917_s23  ;;  %v4599_v16 = vpop.eup %3860 }
 0xc87   :  { %v2539_v11 = vsel %vm200_vm2, %v4599_v16, 0.0 }
 0xc8f   :  { %2772 = vrot.lane.b32.xlu0 %v4516_v17, %s3917_s23  ;;  %v4601_v17 = vpop.eup %3862 }
 0xc90   :  { %v4605_v12 = vpop.eup %3864  ;;  %v2542_v13 = vsel %vm200_vm2, %v4601_v17, 0.0 }
 0xc91   :  { %v2545_v7 = vsel %vm200_vm2, %v4605_v12, 0.0  ;;  %v4611_v14 = vpop.eup %3866 }
 0xc92   :  { %v2548_v15 = vsel %vm200_vm2, %v4611_v14, 0.0 }
 0xca9   :  { %v2532_v63 = vpop.xlane.xlu0 %2531 }
 0xcaa   :  { %3868 = vrcp.f32 %v2532_v63  ;;  %2540 = vadd.xlane.f32.xlu1 %v2539_v11 }
 0xcad   :  { %v2529_v2 = vpop.xlane.xlu1 %2528 }
 0xcae   :  { %3870 = vrcp.f32 %v2529_v2  ;;  %2546 = vadd.xlane.f32.xlu1 %v2545_v7  ;;  %2543 = vadd.xlane.f32.xlu0 %v2542_v13  ;;  %v95_v2 = vld [vmem:[%s4766_s13 + $0x8] sm:$0xff] }
 0xcb2   :  { %2549 = vadd.xlane.f32.xlu0 %v2548_v15 }
 0xcb4   :  { %v3869_v19 = vpop.eup %3868 }
 0xcb5   :  { %v2560_v27 = vmul.f32 %v3869_v19, %v3853_v45 }
 0xcb7   :  { %v2568_v21 = vpack.c.bf16 %v2560_v27, %v2560_v27  ;;  %v96_v27 = vld [vmem:[%s4766_s13 + $0x10] sm:$0xff] }
 0xcb8   :  { %v3871_v30 = vpop.eup %3870 }
 0xcb9   :  { %v2559_v10 = vmul.f32 %v3871_v30, %v4579_v46  ;;  %3634 = vmatmul.mubr.msk.bf16.vlgmr.msra.gmra.mrb[84].mxu0 %vm200_vm2, %v2568_v21  ;;  %v97_v21 = vld [vmem:[%s4766_s13 + $0x18] sm:$0xff] }
 0xcba   :  { %3644 = vmatpush3.bf16.msra.mxu0 %v2729_v24  ;;  %3645 = vmatprep.mubr.msk.bf16.mxu0 %vm3913_vm0, %v3912_v3  ;;  %v2999_v30 = vpack.c.bf16 %v97_v21, %v96_v27 }
 0xcbb   :  { %v2567_v23 = vpack.c.bf16 %v2559_v10, %v2559_v10  ;;  %3655 = vmatprep.subr.bf16.mxu0 %v3912_v3 }
 0xcbd   :  { %3628 = vmatmul.mubr.msk.bf16.vlgmr.msra.gmra.mrb[80].mxu1 %vm200_vm2, %v2567_v23 }
 0xcbe   :  { %3638 = vmatpush3.bf16.msra.mxu1 %v2680_v25  ;;  %3639 = vmatprep.mubr.msk.bf16.mxu1 %vm3913_vm0, %v3912_v3 }
 0xcbf   :  { %2919 = vrot.lane.b32.xlu1 %v4529_v34, %s3917_s23  ;;  %3649 = vmatprep.subr.bf16.mxu1 %v3912_v3 }
 0xcc8   :  { %2870 = vrot.lane.b32.xlu0 %v4531_v37, %s3917_s23 }
 0xd02   :  { %v2535_v26 = vpop.xlane.xlu1 %2534 }
 0xd03   :  { %3872 = vrcp.f32 %v2535_v26 }
 0xd06   :  { %v2538_v28 = vpop.xlane.xlu0 %2537  ;;  %v2822_v34 = vpop.permute.xlu1 %2821 }
 0xd07   :  { %3874 = vrcp.f32 %v2538_v28  ;;  %v2827_v33 = vsel %vm707_vm3, %v2822_v34, 0 }
 0xd0a   :  { %v2773_v38 = vpop.permute.xlu0 %2772 }
 0xd0b   :  { %v2778_v42 = vsel %vm707_vm3, %v2773_v38, 0 }
 0xd0d   :  { %v3873_v29 = vpop.eup %3872 }
 0xd0e   :  { %v2561_v32 = vmul.f32 %v3873_v29, %v4583_v51 }
 0xd10   :  { %v2569_v39 = vpack.c.bf16 %v2561_v32, %v2561_v32 }
 0xd11   :  { %v3875_v40 = vpop.eup %3874 }
 0xd12   :  { %v2562_v41 = vmul.f32 %v3875_v40, %v4587_v55  ;;  %3640 = vmatmul.mubr.msk.bf16.vlgmr.msra.gmra.mrb[84].mxu1 %vm200_vm2, %v2569_v39 }
 0xd13   :  { %3650 = vmatpush3.bf16.msra.mxu1 %v2778_v42  ;;  %3651 = vmatprep.mubr.msk.bf16.mxu1 %vm3913_vm0, %v3912_v3 }
 0xd14   :  { %v2570_v37 = vpack.c.bf16 %v2562_v41, %v2562_v41  ;;  %3661 = vmatprep.subr.bf16.mxu1 %v3912_v3 }
 0xd16   :  { %3646 = vmatmul.mubr.msk.bf16.vlgmr.msra.gmra.mrb[88].mxu0 %vm200_vm2, %v2570_v37 }
 0xd17   :  { %3656 = vmatpush3.bf16.msra.mxu0 %v2827_v33  ;;  %3657 = vmatprep.mubr.msk.bf16.mxu0 %vm3913_vm0, %v3912_v3 }
 0xd18   :  { %3667 = vmatprep.subr.bf16.mxu0 %v3912_v3 }
 0xd37   :  { %v2541_v43 = vpop.xlane.xlu1 %2540 }
 0xd38   :  { %3876 = vrcp.f32 %v2541_v43 }
 0xd3b   :  { %v2547_v44 = vpop.xlane.xlu1 %2546  ;;  %v2544_v35 = vpop.xlane.xlu0 %2543 }
 0xd3c   :  { %3878 = vrcp.f32 %v2547_v44 }
 0xd3d   :  { %3880 = vrcp.f32 %v2544_v35 }
 0xd3f   :  { %v2550_v45 = vpop.xlane.xlu0 %2549  ;;  %v2920_v48 = vpop.permute.xlu1 %2919 }
 0xd40   :  { %3882 = vrcp.f32 %v2550_v45  ;;  %v2925_v54 = vsel %vm707_vm3, %v2920_v48, 0 }
 0xd42   :  { %v3877_v36 = vpop.eup %3876 }
 0xd43   :  { %v2563_v46 = vmul.f32 %v3877_v36, %v4599_v16  ;;  %v2871_v50 = vpop.permute.xlu0 %2870 }
 0xd44   :  { %v2876_v49 = vsel %vm707_vm3, %v2871_v50, 0 }
 0xd45   :  { %v2571_v60 = vpack.c.bf16 %v2563_v46, %v2563_v46 }
 0xd46   :  { %v3879_v0 = vpop.eup %3878 }
 0xd47   :  { %v3881_v47 = vpop.eup %3880  ;;  %3652 = vmatmul.mubr.msk.bf16.vlgmr.msra.gmra.mrb[88].mxu1 %vm200_vm2, %v2571_v60  ;;  %v2565_v22 = vmul.f32 %v3879_v0, %v4605_v12  ;;  %v94_v12 = vld [vmem:[%s4766_s13] sm:$0xff] }
 0xd48   :  { %v2564_v31 = vmul.f32 %v3881_v47, %v4601_v17  ;;  %3662 = vmatpush3.bf16.msra.mxu1 %v2876_v49  ;;  %3663 = vmatprep.mubr.msk.bf16.mxu1 %vm3913_vm0, %v3912_v3  ;;  %v2998_v7 = vpack.c.bf16 %v95_v2, %v94_v12  ;;  %v110_v12 = vld [vmem:[%s4770_s17 + $0x30] sm:$0xff]  ;;  %v111_v2 = vld [vmem:[%s4770_s17 + $0x38] sm:$0xff] }
 0xd49   :  { %3673 = vmatprep.subr.bf16.mxu1 %v3912_v3  ;;  %v2573_v55 = vpack.c.bf16 %v2565_v22, %v2565_v22 }
 0xd4a   :  { %v2572_v51 = vpack.c.bf16 %v2564_v31, %v2564_v31  ;;  %v3883_v53 = vpop.eup %3882 }
 0xd4b   :  { %v2566_v56 = vmul.f32 %v3883_v53, %v4611_v14  ;;  %v100_v53 = vld [vmem:[%s4768_s15 + $0x8] sm:$0xff] }
 0xd4c   :  { %3658 = vmatmul.mubr.msk.bf16.vlgmr.msra.gmra.mrb[92].mxu0 %vm200_vm2, %v2572_v51  ;;  %v99_v51 = vld [vmem:[%s4768_s15] sm:$0xff] }
 0xd4d   :  { %3668 = vmatpush3.bf16.msra.mxu0 %v2925_v54  ;;  %3669 = vmatprep.mubr.msk.bf16.mxu0 %vm3913_vm0, %v3912_v3  ;;  %v2574_v57 = vpack.c.bf16 %v2566_v56, %v2566_v56  ;;  %v3051_v54 = vpack.c.bf16 %v100_v53, %v99_v51  ;;  %v102_v56 = vld [vmem:[%s4768_s15 + $0x18] sm:$0xff] }
 0xd4e   :  { %3681 = vmatprep.subr.bf16.mxu0 %v3912_v3 }
 0xd4f   :  { %3664 = vmatmul.mubr.msk.bf16.vlgmr.msra.gmra.mrb[92].mxu1 %vm200_vm2, %v2573_v55  ;;  %v101_v55 = vld [vmem:[%s4768_s15 + $0x10] sm:$0xff] }
 0xd50   :  { %3677 = vmatprep.mubr.msk.bf16.mxu1 %vm3913_vm0, %v3912_v3  ;;  %3674 = vmatpush3.bf16.msra.mxu1 %v2998_v7  ;;  %v3125_v7 = vpack.c.bf16 %v111_v2, %v110_v12 }
 0xd51   :  { %3675 = vmatprep.subr.bf16.mxu1 %v3912_v3 }
 0xd54   :  { %3670 = vmatmul.mubr.msk.bf16.vlgmr.msra.gmra.mrb[96].mxu0 %vm200_vm2, %v2574_v57  ;;  %3676 = vmatpush3.bf16.msra.mxu1 %v2999_v30  ;;  %v3052_v57 = vpack.c.bf16 %v102_v56, %v101_v55 }
 0xd55   :  { %3685 = vmatprep.mubr.msk.bf16.mxu0 %vm3913_vm0, %v3912_v3  ;;  %3689 = vmatprep.subr.bf16.mxu1 %v3912_v3 }
 0xd56   :  { %3682 = vmatpush3.bf16.msra.mxu0 %v3051_v54 }
 0xd57   :  { %3683 = vmatprep.subr.bf16.mxu0 %v3912_v3 }
 0xd5a   :  { %3684 = vmatpush3.bf16.msra.mxu0 %v3052_v57 }
 0xd8c   :  { %v2667_v59 = vpop.f32.mrb[84].mxu0 }
 0xd8d   :  { %v3635_v61 = vpop.f32.mrb[85].mxu0 }
 0xd8e   :  { %v2670_v20 = vpop.f32.mrb[86].mxu0 }
 0xd8f   :  { %v3636_v52 = vpop.f32.mrb[87].mxu0 }
 0xd90   :  { %v2618_v62 = vpop.f32.mrb[80].mxu1 }
 0xd91   :  { %v3629_v58 = vpop.f32.mrb[81].mxu1 }
 0xd92   :  { %v2621_v18 = vpop.f32.mrb[82].mxu1 }
 0xd93   :  { %v3630_v1 = vpop.f32.mrb[83].mxu1 }
 0xde5   :  { %v2716_v6 = vpop.f32.mrb[84].mxu1 }
 0xde6   :  { %v3641_v9 = vpop.f32.mrb[85].mxu1 }
 0xde7   :  { %v2719_v4 = vpop.f32.mrb[86].mxu1  ;;  %v105_v9 = vld [vmem:[%s4770_s17 + $0x8] sm:$0xff] }
 0xde8   :  { %v3642_v5 = vpop.f32.mrb[87].mxu1 }
 0xde9   :  { %v2765_v16 = vpop.f32.mrb[88].mxu0  ;;  %v106_v5 = vld [vmem:[%s4770_s17 + $0x10] sm:$0xff] }
 0xdea   :  { %v3773_v17 = vpack.i.bf16 %v2765_v16, %v2716_v6  ;;  %v3647_v8 = vpop.f32.mrb[89].mxu0  ;;  %v104_v6 = vld [vmem:[%s4770_s17] sm:$0xff]  ;;  %v107_v16 = vld [vmem:[%s4770_s17 + $0x18] sm:$0xff] }
 0xdeb   :  { %v2768_v63 = vpop.f32.mrb[90].mxu0  ;;  %v3122_v4 = vpack.c.bf16 %v105_v9, %v104_v6  ;;  %v108_v8 = vld [vmem:[%s4770_s17 + $0x20] sm:$0xff] }
 0xdec   :  { %3774 = vrot.lane.b32.xlu0 %v3773_v17, %s3919_s27  ;;  %v3648_v11 = vpop.f32.mrb[91].mxu0  ;;  %v3123_v17 = vpack.c.bf16 %v107_v16, %v106_v5  ;;  %v109_v63 = vld [vmem:[%s4770_s17 + $0x28] sm:$0xff] }
 0xded   :  { %v3124_v11 = vpack.c.bf16 %v109_v63, %v108_v8 }
 0xe1a   :  { %v2814_v13 = vpop.f32.mrb[88].mxu1 }
 0xe1b   :  { %v3653_v14 = vpop.f32.mrb[89].mxu1 }
 0xe1c   :  { %v2817_v15 = vpop.f32.mrb[90].mxu1 }
 0xe1d   :  { %v3654_v19 = vpop.f32.mrb[91].mxu1 }
 0xe1f   :  { %v2863_v24 = vpop.f32.mrb[92].mxu0 }
 0xe20   :  { %v3778_v10 = vpack.i.bf16 %v2863_v24, %v2814_v13  ;;  %v3659_v23 = vpop.f32.mrb[93].mxu0  ;;  %v3251_v13 = vld [vmem:[%s4769_s16] ss:$0 sm:$0xff] }
 0xe21   :  { %v2866_v25 = vpop.f32.mrb[94].mxu0 }
 0xe22   :  { %3779 = vrot.lane.b32.xlu1 %v3778_v10, %s3920_s28  ;;  %v3660_v26 = vpop.f32.mrb[95].mxu0  ;;  %v2912_v28 = vpop.f32.mrb[92].mxu1 }
 0xe23   :  { %v3665_v29 = vpop.f32.mrb[93].mxu1 }
 0xe24   :  { %v2915_v32 = vpop.f32.mrb[94].mxu1 }
 0xe25   :  { %v3666_v38 = vpop.f32.mrb[95].mxu1 }
 0xe27   :  { %v2961_v39 = vpop.f32.mrb[96].mxu0 }
 0xe28   :  { %v3783_v40 = vpack.i.bf16 %v2961_v39, %v2912_v28  ;;  %v3671_v41 = vpop.f32.mrb[97].mxu0 }
 0xe29   :  { %v2964_v42 = vpop.f32.mrb[98].mxu0 }
 0xe2a   :  { %3784 = vrot.lane.b32.xlu0 %v3783_v40, %s3921_s7  ;;  %v3672_v34 = vpop.f32.mrb[99].mxu0  ;;  %s3922_s7 = smov [#allocation2]  }
 0xe2b   :  { %s3184_s0 = sshll.u32 %s3922_s7, 4  ;;  %s3185_s0 = int_to_ptr.vmem [resolvable:$true] %s3184_s0 }
 0xe2c   :  { %s3888_s8 = scalar_lea.vmem %s3185_s0, 256  ;;  %p3893_p1 = scmp.lt.s32.totalorder %s3185_s0, %s3185_s0 }
 0xe2d   :  { %p3889_p0 = scmp.ne.s32.totalorder %s3185_s0, %s3888_s8  ;;  %p3894_p2 = scmp.lt.s32.totalorder %s3888_s8, %s3888_s8 }
 0xe2f   :  { %p3895_p3 = por %p3894_p2, %p3893_p1 }
 0xe31   :  { %p3896_p4 = pnand %p3895_p3, %p3889_p0 }
 0xe5e   :  { %v3775_v37 = vpop.permute.xlu0 %3774 }
 0xe5f   :  { %v3777_v43 = vunpack.i.h.bf16 %v3775_v37  ;;  %v3776_v44 = vunpack.i.l.bf16 %v3775_v37 }
 0xe61   :  { %v2992_v46 = vsel %vm200_vm2, %v2667_v59, %v3777_v43  ;;  %v2991_v50 = vsel %vm200_vm2, %v2618_v62, %v3776_v44  ;;  %v3249_v59 = vld [vmem:[%s4767_s14] ss:$0 sm:$0xff] }
 0xe94   :  { %v3780_v33 = vpop.permute.xlu1 %3779 }
 0xe95   :  { %v3782_v35 = vunpack.i.h.bf16 %v3780_v33  ;;  %v3781_v45 = vunpack.i.l.bf16 %v3780_v33 }
 0xe97   :  { %v2994_v47 = vsel %vm1113_vm4, %v2992_v46, %v3782_v35  ;;  %v2993_v49 = vsel %vm1113_vm4, %v2991_v50, %v3781_v45  ;;  %v3253_v35 = vld [vmem:[%s4771_s18] ss:$0 sm:$0xff] }
 0xe9c   :  { %v3785_v36 = vpop.permute.xlu0 %3784 }
 0xe9d   :  { %v3787_v60 = vunpack.i.h.bf16 %v3785_v36  ;;  %v3786_v0 = vunpack.i.l.bf16 %v3785_v36 }
 0xe9f   :  { %v2996_v31 = vsel %vm1116_vm5, %v2994_v47, %v3787_v60  ;;  %v2995_v22 = vsel %vm1116_vm5, %v2993_v49, %v3786_v0 }
 0xea0   :  { %v2997_v48 = vpack.c.bf16 %v2996_v31, %v2995_v22 }
 0xea2   :  { %3678 = vmatmul.mubr.msk.bf16.vlgmr.msra.gmra.mrb[96].mxu1 %vm124_vm1, %v2997_v48 }
 0xea3   :  { %3697 = vmatprep.mubr.msk.bf16.mxu1 %vm3913_vm0, %v3912_v3  ;;  %3690 = vmatpush3.bf16.msra.mxu1 %v3122_v4 }
 0xea4   :  { %3691 = vmatprep.subr.bf16.mxu1 %v3912_v3 }
 0xea7   :  { %3692 = vmatpush3.bf16.msra.mxu1 %v3123_v17 }
 0xea8   :  { %3693 = vmatprep.subr.bf16.mxu1 %v3912_v3 }
 0xeab   :  { %3694 = vmatpush3.bf16.msra.mxu1 %v3124_v11 }
 0xeac   :  { %3695 = vmatprep.subr.bf16.mxu1 %v3912_v3 }
 0xeaf   :  { %3696 = vmatpush3.bf16.msra.mxu1 %v3125_v7 }
 0xf75   :  { %v3043_v61 = vpop.f32.mrb[96].mxu1 }
 0xf76   :  { %v3679_v20 = vpop.f32.mrb[97].mxu1  ;;  %v3044_v62 = vadd.f32 %v3249_v59, %v3043_v61 }
 0xf77   :  { %v3046_v52 = vpop.f32.mrb[98].mxu1 }
 0xf78   :  { %v3047_v58 = vadd.f32 %v3249_v59, %v3046_v52  ;;  %v3680_v18 = vpop.f32.mrb[99].mxu1 }
 0xf7a   :  { %v3050_v1 = vpack.c.bf16 %v3047_v58, %v3044_v62 }
 0xf7c   :  { %3686 = vmatmul.mubr.msk.bf16.vlgmr.msra.gmra.mrb[100].mxu0 %vm124_vm1, %v3050_v1 }
0x104f   :  { %v3096_v14 = vpop.f32.mrb[100].mxu0 }
0x1050   :  { %v3097_v15 = vadd.f32 %v3251_v13, %v3096_v14  ;;  %v3687_v19 = vpop.f32.mrb[101].mxu0 }
0x1051   :  { %v3099_v27 = vpop.f32.mrb[102].mxu0 }
0x1052   :  { %v3103_v21 = vmul.f32 %v3097_v15, %v3097_v15  ;;  %v3100_v3 = vadd.f32 %v3251_v13, %v3099_v27  ;;  %v3688_v30 = vpop.f32.mrb[103].mxu0 }
0x1054   :  { %v3105_v24 = vmul.f32 %v3103_v21, %v3097_v15  ;;  %v3104_v10 = vmul.f32 %v3100_v3, %v3100_v3 }
0x1056   :  { %v3107_v23 = vmul.f32 0.044715, %v3105_v24  ;;  %v3106_v25 = vmul.f32 %v3104_v10, %v3100_v3 }
0x1058   :  { %v3109_v26 = vadd.f32 %v3107_v23, %v3097_v15  ;;  %v3108_v28 = vmul.f32 0.044715, %v3106_v25 }
0x105a   :  { %v3111_v29 = vmul.f32 0.7978846, %v3109_v26  ;;  %v3110_v32 = vadd.f32 %v3108_v28, %v3100_v3 }
0x105c   :  { %3884 = vtanh.f32 %v3111_v29  ;;  %v3112_v38 = vmul.f32 0.7978846, %v3110_v32 }
0x105e   :  { %3886 = vtanh.f32 %v3112_v38 }
0x1066   :  { %v3885_v39 = vpop.eup %3884 }
0x1067   :  { %v3115_v40 = vadd.f32 1.0, %v3885_v39 }
0x1068   :  { %v3887_v41 = vpop.eup %3886 }
0x1069   :  { %v3117_v42 = vmul.f32 0.5, %v3115_v40  ;;  %v3116_v34 = vadd.f32 1.0, %v3887_v41 }
0x106b   :  { %v3118_v37 = vmul.f32 0.5, %v3116_v34  ;;  %v3119_v33 = vmul.f32 %v3117_v42, %v3097_v15 }
0x106d   :  { %v3120_v43 = vmul.f32 %v3118_v37, %v3100_v3 }
0x106f   :  { %v3121_v44 = vpack.c.bf16 %v3120_v43, %v3119_v33 }
0x1071   :  { %3698 = vmatmul.mubr.msk.bf16.vlgmr.msra.gmra.mrb[100].mxu1 %vm3132_vm6, %v3121_v44 }
0x1144   :  { %v3170_v45 = vpop.f32.mrb[100].mxu1 }
0x1145   :  { %v3171_v36 = vadd.f32 %v3253_v35, %v3170_v45  ;;  %v3699_v46 = vpop.f32.mrb[101].mxu1 }
0x1146   :  { %v3173_v50 = vpop.f32.mrb[102].mxu1 }
0x1147   :  { %3177 = vst.msk [vmem:[#allocation2] sm:$0xff] %vm124_vm1, %v3171_v36  ;;  %v3174_v60 = vadd.f32 %v3253_v35, %v3173_v50  ;;  %v3700_v0 = vpop.f32.mrb[103].mxu1 }
0x1149   :  { %3178 = vst.msk [vmem:[#allocation2 + $0x8] sm:$0xff] %vm124_vm1, %v3174_v60 }
0x114a   :  { %3899 = shalt.err (!%p3896_p4)
}
0x114b   :  { %s3900_s30 = scalar_lea.hbm %s4772_s19, 256 }
0x114c   :  { %p3901_p5 = scmp.ne.s32.totalorder %s4772_s19, %s3900_s30  ;;  %p3904_p6 = scmp.lt.u32.totalorder %s3900_s30, %s4772_s19 }
0x114e   :  { %p3906_p7 = pnand %p3904_p6, %p3901_p5 }
0x1150   :  { %3909 = shalt.err (!%p3906_p7)
}
0x1151   :  { %s3923_s4 = smov 128  }
0x1152   :  { %3190 = dma.vmem_to_hbm [thread:$0]  %s3185_s0, 256, %s4772_s19, [#allocation3], %s3923_s4, %s3923_s4, %s3919_s27  }
0x1153   :  { %3910 = dma.done.wait [#allocation3], 256  }
0x1154   :  { %3911 = vsyncadd [#allocation3], 4294967040 }
0x1155   :  { %3194 = vsyncpa [#allocation3], 1 }

</bundles_post_ra>
